<compile_context>
chip_gen: v6e
topology: v6e:2x2x1
jax: 0.10.0
libtpu: 0.0.40
codegen_flags: <defaults>
</compile_context>

<pallas_src>
import jax
import jax.numpy as jnp
from jax.experimental import pallas as pl
from jax.experimental.pallas import tpu as pltpu

D_IN, H1, H2, H3, D_OUT = 446, 512, 256, 128, 30


def _mlp_kernel(x_ref, w1_ref, b1_ref, w2_ref, b2_ref, w3_ref, b3_ref,
                w4_ref, b4_ref, y_ref, h_ref):
    # fc1 -> tanh -> fc2 -> tanh -> fc3 -> tanh (= h) -> fc4 (= y)
    x = x_ref[...]
    a1 = jnp.tanh(jnp.dot(x, w1_ref[...],
                          preferred_element_type=jnp.float32) + b1_ref[...])
    a2 = jnp.tanh(jnp.dot(a1, w2_ref[...],
                          preferred_element_type=jnp.float32) + b2_ref[...])
    a3 = jnp.tanh(jnp.dot(a2, w3_ref[...],
                          preferred_element_type=jnp.float32) + b3_ref[...])
    h_ref[...] = a3.astype(h_ref.dtype)
    y_ref[...] = (jnp.dot(a3, w4_ref[...],
                          preferred_element_type=jnp.float32)
                  + b4_ref[...]).astype(y_ref.dtype)


def _round_up(x, m):
    return ((x + m - 1) // m) * m


def net_location30(x, params, *, batch_tile=None):
    """x: (B, 446) f32 -> (y: (B, 30) f32, h: (B, 128) f32)."""
    w1, b1, w2, b2, w3, b3, w4, b4 = params
    B, d_in = x.shape
    assert d_in == D_IN

    if batch_tile is None:
        # Big tiles amortize grid-step overhead; a 1024-row tile uses ~4 MiB of
        # VMEM for x/h1 even double-buffered, far under every chip's budget.
        # Small batches collapse to a single grid step (no pipeline overhead).
        batch_tile = min(_round_up(B, 8), 1024)
    batch_tile = _round_up(batch_tile, 8)

    B_pad = _round_up(B, batch_tile)
    if B_pad != B:
        x = jnp.pad(x, ((0, B_pad - B), (0, 0)))  # pad batch instead of asserting
    grid = (B_pad // batch_tile,)

    bcast = lambda i: (0, 0)  # weights/biases shared across all batch tiles

    cost = pl.CostEstimate(
        flops=2 * B_pad * (D_IN * H1 + H1 * H2 + H2 * H3 + H3 * D_OUT),
        transcendentals=B_pad * (H1 + H2 + H3),
        bytes_accessed=4 * (B_pad * (D_IN + D_OUT + H3)
                            + D_IN * H1 + H1 + H1 * H2 + H2
                            + H2 * H3 + H3 + H3 * D_OUT + D_OUT),
    )

    y, h = pl.pallas_call(
        _mlp_kernel,
        out_shape=(jax.ShapeDtypeStruct((B_pad, D_OUT), jnp.float32),
                   jax.ShapeDtypeStruct((B_pad, H3), jnp.float32)),
        grid_spec=pltpu.PrefetchScalarGridSpec(
            num_scalar_prefetch=0,
            grid=grid,
            in_specs=[
                pl.BlockSpec((batch_tile, D_IN), lambda i: (i, 0)),  # x tile
                pl.BlockSpec((D_IN, H1), bcast),                     # w1
                pl.BlockSpec((1, H1), bcast),                        # b1
                pl.BlockSpec((H1, H2), bcast),                       # w2
                pl.BlockSpec((1, H2), bcast),                        # b2
                pl.BlockSpec((H2, H3), bcast),                       # w3
                pl.BlockSpec((1, H3), bcast),                        # b3
                pl.BlockSpec((H3, D_OUT), bcast),                    # w4
                pl.BlockSpec((1, D_OUT), bcast),                     # b4
            ],
            out_specs=[
                pl.BlockSpec((batch_tile, D_OUT), lambda i: (i, 0)),  # y
                pl.BlockSpec((batch_tile, H3), lambda i: (i, 0)),     # h
            ],
        ),
        compiler_params=pltpu.CompilerParams(
            dimension_semantics=("parallel",)),   # shards batch grid on v7x's 2 TCs
        cost_estimate=cost,
    )(x, w1, b1, w2, b2, w3, b3, w4, b4)

    if B_pad != B:
        y, h = y[:B], h[:B]
    return y, h


def init_params(key):
    """Deterministic init matching nn.Linear default (uniform +-1/sqrt(fan_in))."""
    dims = [(D_IN, H1), (H1, H2), (H2, H3), (H3, D_OUT)]
    keys = jax.random.split(key, 2 * len(dims))
    params = []
    for n, (fi, fo) in enumerate(dims):
        bound = 1.0 / jnp.sqrt(jnp.float32(fi))
        w = jax.random.uniform(keys[2 * n], (fi, fo), jnp.float32, -bound, bound)
        b = jax.random.uniform(keys[2 * n + 1], (1, fo), jnp.float32, -bound, bound)
        params += [w, b]
    return tuple(params)


def reference(x, params):
    w1, b1, w2, b2, w3, b3, w4, b4 = params
    hp = jax.lax.Precision.HIGHEST
    a1 = jnp.tanh(jnp.dot(x, w1, precision=hp) + b1)
    a2 = jnp.tanh(jnp.dot(a1, w2, precision=hp) + b2)
    a3 = jnp.tanh(jnp.dot(a2, w3, precision=hp) + b3)
    y = jnp.dot(a3, w4, precision=hp) + b4
    return y, a3


if __name__ == "__main__":
    key = jax.random.PRNGKey(0)
    kx, kp = jax.random.split(key)
    B = 16
    x = jax.random.normal(kx, (B, D_IN), jnp.float32)
    params = init_params(kp)

    y, h = net_location30(x, params)
    y = jax.block_until_ready(y)
    h = jax.block_until_ready(h)

    y_ref, h_ref = reference(x, params)
    assert y.shape == (B, D_OUT) and h.shape == (B, H3)
    assert jnp.allclose(y, y_ref, atol=1e-3, rtol=1e-3), "y mismatch vs reference"
    assert jnp.allclose(h, h_ref, atol=1e-3, rtol=1e-3), "h mismatch vs reference"
    print("KERNEL_OK")
</pallas_src>

<mosaic_0001>
module attributes {stable_mosaic.version = 11 : i64} {
  func.func @_mlp_kernel(%arg0: i32, %arg1: memref<16x446xf32, #tpu.memory_space<vmem>>, %arg2: memref<446x512xf32, #tpu.memory_space<vmem>>, %arg3: memref<1x512xf32, #tpu.memory_space<vmem>>, %arg4: memref<512x256xf32, #tpu.memory_space<vmem>>, %arg5: memref<1x256xf32, #tpu.memory_space<vmem>>, %arg6: memref<256x128xf32, #tpu.memory_space<vmem>>, %arg7: memref<1x128xf32, #tpu.memory_space<vmem>>, %arg8: memref<128x30xf32, #tpu.memory_space<vmem>>, %arg9: memref<1x30xf32, #tpu.memory_space<vmem>>, %arg10: memref<16x30xf32, #tpu.memory_space<vmem>>, %arg11: memref<16x128xf32, #tpu.memory_space<vmem>>) attributes {dimension_semantics = [#tpu.dimension_semantics<parallel>], iteration_bounds = array<i64: 1>, scalar_prefetch = 0 : i64, scratch_operands = 0 : i64, tpu.core_type = #tpu.core_type<tc>, window_params = [{transform_indices = @transform_0, window_bounds = array<i64: 16, 446>}, {pipeline_mode = #tpu.pipeline_mode<synchronous>, transform_indices = @transform_1, window_bounds = array<i64: 446, 512>}, {pipeline_mode = #tpu.pipeline_mode<synchronous>, transform_indices = @transform_2, window_bounds = array<i64: 1, 512>}, {pipeline_mode = #tpu.pipeline_mode<synchronous>, transform_indices = @transform_3, window_bounds = array<i64: 512, 256>}, {pipeline_mode = #tpu.pipeline_mode<synchronous>, transform_indices = @transform_4, window_bounds = array<i64: 1, 256>}, {pipeline_mode = #tpu.pipeline_mode<synchronous>, transform_indices = @transform_5, window_bounds = array<i64: 256, 128>}, {pipeline_mode = #tpu.pipeline_mode<synchronous>, transform_indices = @transform_6, window_bounds = array<i64: 1, 128>}, {pipeline_mode = #tpu.pipeline_mode<synchronous>, transform_indices = @transform_7, window_bounds = array<i64: 128, 30>}, {pipeline_mode = #tpu.pipeline_mode<synchronous>, transform_indices = @transform_8, window_bounds = array<i64: 1, 30>}, {transform_indices = @transform_9, window_bounds = array<i64: 16, 30>}, {transform_indices = @transform_10, window_bounds = array<i64: 16, 128>}]} {
    %c0 = arith.constant 0 : index
    %c0_0 = arith.constant 0 : index
    %0 = vector.load %arg1[%c0, %c0_0] : memref<16x446xf32, #tpu.memory_space<vmem>>, vector<16x446xf32>
    %c0_1 = arith.constant 0 : index
    %c0_2 = arith.constant 0 : index
    %1 = vector.load %arg2[%c0_1, %c0_2] : memref<446x512xf32, #tpu.memory_space<vmem>>, vector<446x512xf32>
    %cst = arith.constant dense<0.000000e+00> : vector<16x512xf32>
    %2 = tpu.matmul %0, %1, %cst {dimension_numbers = #tpu.dot_dimension_numbers<[1], [0], [0], [1], [0, 0, 1, 1], [], []>} : vector<16x446xf32>, vector<446x512xf32>, vector<16x512xf32> -> vector<16x512xf32>
    %c0_3 = arith.constant 0 : index
    %c0_4 = arith.constant 0 : index
    %3 = vector.load %arg3[%c0_3, %c0_4] : memref<1x512xf32, #tpu.memory_space<vmem>>, vector<1x512xf32>
    %4 = vector.broadcast %3 : vector<1x512xf32> to vector<16x512xf32>
    %5 = arith.addf %2, %4 : vector<16x512xf32>
    %6 = math.tanh %5 : vector<16x512xf32>
    %c0_5 = arith.constant 0 : index
    %c0_6 = arith.constant 0 : index
    %7 = vector.load %arg4[%c0_5, %c0_6] : memref<512x256xf32, #tpu.memory_space<vmem>>, vector<512x256xf32>
    %cst_7 = arith.constant dense<0.000000e+00> : vector<16x256xf32>
    %8 = tpu.matmul %6, %7, %cst_7 {dimension_numbers = #tpu.dot_dimension_numbers<[1], [0], [0], [1], [0, 0, 1, 1], [], []>} : vector<16x512xf32>, vector<512x256xf32>, vector<16x256xf32> -> vector<16x256xf32>
    %c0_8 = arith.constant 0 : index
    %c0_9 = arith.constant 0 : index
    %9 = vector.load %arg5[%c0_8, %c0_9] : memref<1x256xf32, #tpu.memory_space<vmem>>, vector<1x256xf32>
    %10 = vector.broadcast %9 : vector<1x256xf32> to vector<16x256xf32>
    %11 = arith.addf %8, %10 : vector<16x256xf32>
    %12 = math.tanh %11 : vector<16x256xf32>
    %c0_10 = arith.constant 0 : index
    %c0_11 = arith.constant 0 : index
    %13 = vector.load %arg6[%c0_10, %c0_11] : memref<256x128xf32, #tpu.memory_space<vmem>>, vector<256x128xf32>
    %cst_12 = arith.constant dense<0.000000e+00> : vector<16x128xf32>
    %14 = tpu.matmul %12, %13, %cst_12 {dimension_numbers = #tpu.dot_dimension_numbers<[1], [0], [0], [1], [0, 0, 1, 1], [], []>} : vector<16x256xf32>, vector<256x128xf32>, vector<16x128xf32> -> vector<16x128xf32>
    %c0_13 = arith.constant 0 : index
    %c0_14 = arith.constant 0 : index
    %15 = vector.load %arg7[%c0_13, %c0_14] : memref<1x128xf32, #tpu.memory_space<vmem>>, vector<1x128xf32>
    %16 = vector.broadcast %15 : vector<1x128xf32> to vector<16x128xf32>
    %17 = arith.addf %14, %16 : vector<16x128xf32>
    %18 = math.tanh %17 : vector<16x128xf32>
    %c0_15 = arith.constant 0 : index
    %c0_16 = arith.constant 0 : index
    %19 = vector.load %arg11[%c0_15, %c0_16] : memref<16x128xf32, #tpu.memory_space<vmem>>, vector<16x128xf32>
    tpu.vector_store %arg11[%c0_15, %c0_16], %18 {strides = array<i32>} : memref<16x128xf32, #tpu.memory_space<vmem>>, vector<16x128xf32>,
    %c0_17 = arith.constant 0 : index
    %c0_18 = arith.constant 0 : index
    %20 = vector.load %arg8[%c0_17, %c0_18] : memref<128x30xf32, #tpu.memory_space<vmem>>, vector<128x30xf32>
    %cst_19 = arith.constant dense<0.000000e+00> : vector<16x30xf32>
    %21 = tpu.matmul %18, %20, %cst_19 {dimension_numbers = #tpu.dot_dimension_numbers<[1], [0], [0], [1], [0, 0, 1, 1], [], []>} : vector<16x128xf32>, vector<128x30xf32>, vector<16x30xf32> -> vector<16x30xf32>
    %c0_20 = arith.constant 0 : index
    %c0_21 = arith.constant 0 : index
    %22 = vector.load %arg9[%c0_20, %c0_21] : memref<1x30xf32, #tpu.memory_space<vmem>>, vector<1x30xf32>
    %23 = vector.broadcast %22 : vector<1x30xf32> to vector<16x30xf32>
    %24 = arith.addf %21, %23 : vector<16x30xf32>
    %c0_22 = arith.constant 0 : index
    %c0_23 = arith.constant 0 : index
    %25 = vector.load %arg10[%c0_22, %c0_23] : memref<16x30xf32, #tpu.memory_space<vmem>>, vector<16x30xf32>
    tpu.vector_store %arg10[%c0_22, %c0_23], %24 {strides = array<i32>} : memref<16x30xf32, #tpu.memory_space<vmem>>, vector<16x30xf32>,
    return
  }
  func.func @transform_0(%arg0: i32) -> (i32, i32) {
    %c0_i32 = arith.constant 0 : i32
    %c0_i32_0 = arith.constant 0 : i32
    return %arg0, %c0_i32 : i32, i32
  }
  func.func @transform_1(%arg0: i32) -> (i32, i32) {
    %c0_i32 = arith.constant 0 : i32
    %c0_i32_0 = arith.constant 0 : i32
    %c0_i32_1 = arith.constant 0 : i32
    return %c0_i32, %c0_i32_0 : i32, i32
  }
  func.func @transform_2(%arg0: i32) -> (i32, i32) {
    %c0_i32 = arith.constant 0 : i32
    %c0_i32_0 = arith.constant 0 : i32
    %c0_i32_1 = arith.constant 0 : i32
    return %c0_i32, %c0_i32_0 : i32, i32
  }
  func.func @transform_3(%arg0: i32) -> (i32, i32) {
    %c0_i32 = arith.constant 0 : i32
    %c0_i32_0 = arith.constant 0 : i32
    %c0_i32_1 = arith.constant 0 : i32
    return %c0_i32, %c0_i32_0 : i32, i32
  }
  func.func @transform_4(%arg0: i32) -> (i32, i32) {
    %c0_i32 = arith.constant 0 : i32
    %c0_i32_0 = arith.constant 0 : i32
    %c0_i32_1 = arith.constant 0 : i32
    return %c0_i32, %c0_i32_0 : i32, i32
  }
  func.func @transform_5(%arg0: i32) -> (i32, i32) {
    %c0_i32 = arith.constant 0 : i32
    %c0_i32_0 = arith.constant 0 : i32
    %c0_i32_1 = arith.constant 0 : i32
    return %c0_i32, %c0_i32_0 : i32, i32
  }
  func.func @transform_6(%arg0: i32) -> (i32, i32) {
    %c0_i32 = arith.constant 0 : i32
    %c0_i32_0 = arith.constant 0 : i32
    %c0_i32_1 = arith.constant 0 : i32
    return %c0_i32, %c0_i32_0 : i32, i32
  }
  func.func @transform_7(%arg0: i32) -> (i32, i32) {
    %c0_i32 = arith.constant 0 : i32
    %c0_i32_0 = arith.constant 0 : i32
    %c0_i32_1 = arith.constant 0 : i32
    return %c0_i32, %c0_i32_0 : i32, i32
  }
  func.func @transform_8(%arg0: i32) -> (i32, i32) {
    %c0_i32 = arith.constant 0 : i32
    %c0_i32_0 = arith.constant 0 : i32
    %c0_i32_1 = arith.constant 0 : i32
    return %c0_i32, %c0_i32_0 : i32, i32
  }
  func.func @transform_9(%arg0: i32) -> (i32, i32) {
    %c0_i32 = arith.constant 0 : i32
    %c0_i32_0 = arith.constant 0 : i32
    return %arg0, %c0_i32 : i32, i32
  }
  func.func @transform_10(%arg0: i32) -> (i32, i32) {
    %c0_i32 = arith.constant 0 : i32
    %c0_i32_0 = arith.constant 0 : i32
    return %arg0, %c0_i32 : i32, i32
  }
}

</mosaic_0001>

<bundles_post_ra>
// kernel: tpu_custom_call.1
= control target key start
LH: loop header
LB: loop body
LE: loop exit
PB: predicated region body
PF: predicated region fallthrough
CT: control target
= control target key end

     0   :  { %16 = vsyncpa [#allocation3], 0  ;;  %s1686_s0 = inlined_call_operand.vmem [shape: f32[16,446], index: 0, kind: input, shape index: {}]   ;;  %s1687_s1 = inlined_call_operand.hbm [shape: f32[446,512], index: 1, kind: input, shape index: {}]   ;;  %s1688_s2 = inlined_call_operand.vmem [shape: f32[1,512], index: 2, kind: input, shape index: {}]   ;;  %s1689_s3 = inlined_call_operand.hbm [shape: f32[512,256], index: 3, kind: input, shape index: {}]   ;;  %s1690_s4 = inlined_call_operand.vmem [shape: f32[1,256], index: 4, kind: input, shape index: {}]   ;;  %s1691_s5 = inlined_call_operand.hbm [shape: f32[256,128], index: 5, kind: input, shape index: {}]   ;;  %s1692_s6 = inlined_call_operand.vmem [shape: f32[1,128], index: 6, kind: input, shape index: {}]   ;;  %s1693_s7 = inlined_call_operand.vmem [shape: f32[128,30], index: 7, kind: input, shape index: {}]   ;;  %s1694_s8 = inlined_call_operand.vmem [shape: f32[1,30], index: 8, kind: input, shape index: {}]   ;;  %s1695_s9 = inlined_call_operand.hbm [shape: f32[16,30], index: 9, kind: output, shape index: {0}]   ;;  %s1696_s10 = inlined_call_operand.hbm [shape: f32[16,128], index: 10, kind: output, shape index: {1}]  }
   0x1   :  { %17 = vsyncpa [#allocation6], 0 }
   0x2   :  { %18 = vsyncpa [#allocation4], 0 }
   0x3   :  { %19 = vsyncpa [#allocation10], 0  ;;  %s1466_s13 = smov [#allocation5]  }
   0x4   :  { %s41_s14 = sshll.u32 %s1466_s13, 4  ;;  %s42_s14 = int_to_ptr.vmem [resolvable:$true] %s41_s14 }
   0x5   :  { %s1366_s15 = scalar_lea.vmem %s42_s14, 16384  ;;  %p1371_p1 = scmp.lt.s32.totalorder %s42_s14, %s42_s14 }
   0x6   :  { %p1367_p0 = scmp.ne.s32.totalorder %s42_s14, %s1366_s15  ;;  %p1372_p2 = scmp.lt.s32.totalorder %s1366_s15, %s1366_s15 }
   0x8   :  { %p1373_p3 = por %p1372_p2, %p1371_p1 }
   0xa   :  { %p1374_p4 = pnand %p1373_p3, %p1367_p0 }
   0xc   :  { %1377 = shalt.err (!%p1374_p4)
}
   0xd   :  { %s1467_s16 = smov 256   ;;  %s1468_s17 = smov 16  }
   0xe   :  { %47 = dma.hbm_to_vmem [thread:$0]  %s1689_s3, 16384, %s42_s14, [#allocation6], %s1467_s16, %s1467_s16, %s1468_s17  }
   0xf   :  { %s1469_s20 = smov [#allocation2]  }
  0x10   :  { %s27_s21 = sshll.u32 %s1469_s20, 4  ;;  %s28_s21 = int_to_ptr.vmem [resolvable:$true] %s27_s21 }
  0x11   :  { %s1386_s22 = scalar_lea.vmem %s28_s21, 28672  ;;  %p1391_p6 = scmp.lt.s32.totalorder %s28_s21, %s28_s21 }
  0x12   :  { %p1387_p5 = scmp.ne.s32.totalorder %s28_s21, %s1386_s22  ;;  %p1392_p7 = scmp.lt.s32.totalorder %s1386_s22, %s1386_s22 }
  0x14   :  { %p1393_p8 = por %p1392_p7, %p1391_p6 }
  0x16   :  { %p1394_p9 = pnand %p1393_p8, %p1387_p5 }
  0x18   :  { %1397 = shalt.err (!%p1394_p9)
}
  0x19   :  { %s1470_s23 = smov 512   ;;  %s1471_s24 = smov 32  }
  0x1a   :  { %33 = dma.hbm_to_vmem [thread:$0]  %s1687_s1, 28672, %s28_s21, [#allocation3], %s1470_s23, %s1470_s23, %s1471_s24  }
  0x1b   :  { %s1472_s27 = smov [#allocation7]  }
  0x1c   :  { %s55_s28 = sshll.u32 %s1472_s27, 4  ;;  %s56_s28 = int_to_ptr.vmem [resolvable:$true] %s55_s28 }
  0x1d   :  { %s1406_s3 = scalar_lea.vmem %s56_s28, 4096  ;;  %p1411_p11 = scmp.lt.s32.totalorder %s56_s28, %s56_s28 }
  0x1e   :  { %p1407_p10 = scmp.ne.s32.totalorder %s56_s28, %s1406_s3  ;;  %p1412_p12 = scmp.lt.s32.totalorder %s1406_s3, %s1406_s3 }
  0x20   :  { %p1413_p13 = por %p1412_p12, %p1411_p11 }
  0x22   :  { %p1414_p0 = pnand %p1413_p13, %p1407_p10 }
  0x24   :  { %1417 = shalt.err (!%p1414_p0)
}
  0x25   :  { %s1473_s29 = smov 128   ;;  %s1474_s30 = smov 8  }
  0x26   :  { %61 = dma.hbm_to_vmem [thread:$0]  %s1691_s5, 4096, %s56_s28, [#allocation6], %s1473_s29, %s1473_s29, %s1474_s30  }
  0x27   :  { %1458 = dma.done.wait [#allocation3], 28672  }
  0x28   :  { %1459 = vsyncadd [#allocation3], 4294938624 }
  0x29   :  { %1460 = dma.done.wait [#allocation6], 20480  }
  0x2a   :  { %1461 = vsyncadd [#allocation6], 4294946816  ;;  %v146_v0 = vld [vmem:[#allocation2 + $0x1e8] sm:$0xff]  ;;  %v145_v2 = vld [vmem:[#allocation2 + $0x1e0] sm:$0xff]  ;;  %vm338_vm0 = vcmask 1045504   ;;  %vm331_vm1 = vcmask 506880  }
  0x2b   :  { %v274_v1 = vld [vmem:[#allocation2 + $0x5e8] sm:$0xff]  ;;  %351 = vmatprep.subr.mxu0 %v146_v0  ;;  %v273_v3 = vld [vmem:[#allocation2 + $0x5e0] sm:$0xff] }
  0x2c   :  { %428 = vmatprep.subr.mxu1 %v274_v1  ;;  %v142_v4 = vld [vmem:[#allocation2 + $0x1c8] sm:$0xff]  ;;  %352 = vmatpush1.msra.mxu0 %v145_v2  ;;  %v141_v6 = vld [vmem:[#allocation2 + $0x1c0] sm:$0xff] }
  0x2d   :  { %v270_v5 = vld [vmem:[#allocation2 + $0x5c8] sm:$0xff]  ;;  %429 = vmatpush1.msra.mxu1 %v273_v3  ;;  %v269_v7 = vld [vmem:[#allocation2 + $0x5c0] sm:$0xff]  ;;  %353 = vmatprep.subr.mxu0 %v142_v4 }
  0x2e   :  { %v138_v8 = vld [vmem:[#allocation2 + $0x1a8] sm:$0xff]  ;;  %430 = vmatprep.subr.mxu1 %v270_v5  ;;  %v137_v10 = vld [vmem:[#allocation2 + $0x1a0] sm:$0xff]  ;;  %354 = vmatpush1.msra.mxu0 %v141_v6 }
  0x2f   :  { %v266_v9 = vld [vmem:[#allocation2 + $0x5a8] sm:$0xff]  ;;  %v265_v11 = vld [vmem:[#allocation2 + $0x5a0] sm:$0xff]  ;;  %431 = vmatpush1.msra.mxu1 %v269_v7  ;;  %355 = vmatprep.subr.mxu0 %v138_v8 }
  0x30   :  { %v134_v12 = vld [vmem:[#allocation2 + $0x188] sm:$0xff]  ;;  %432 = vmatprep.subr.mxu1 %v266_v9  ;;  %v133_v14 = vld [vmem:[#allocation2 + $0x180] sm:$0xff]  ;;  %356 = vmatpush1.msra.mxu0 %v137_v10 }
  0x31   :  { %v262_v13 = vld [vmem:[#allocation2 + $0x588] sm:$0xff]  ;;  %v261_v15 = vld [vmem:[#allocation2 + $0x580] sm:$0xff]  ;;  %433 = vmatpush1.msra.mxu1 %v265_v11  ;;  %357 = vmatprep.subr.mxu0 %v134_v12 }
  0x32   :  { %v130_v16 = vld [vmem:[#allocation2 + $0x168] sm:$0xff]  ;;  %434 = vmatprep.subr.mxu1 %v262_v13  ;;  %v129_v18 = vld [vmem:[#allocation2 + $0x160] sm:$0xff]  ;;  %358 = vmatpush1.msra.mxu0 %v133_v14 }
  0x33   :  { %v258_v17 = vld [vmem:[#allocation2 + $0x568] sm:$0xff]  ;;  %v257_v19 = vld [vmem:[#allocation2 + $0x560] sm:$0xff]  ;;  %435 = vmatpush1.msra.mxu1 %v261_v15  ;;  %359 = vmatprep.subr.mxu0 %v130_v16 }
  0x34   :  { %v126_v20 = vld [vmem:[#allocation2 + $0x148] sm:$0xff]  ;;  %436 = vmatprep.subr.mxu1 %v258_v17  ;;  %v125_v22 = vld [vmem:[#allocation2 + $0x140] sm:$0xff]  ;;  %360 = vmatpush1.msra.mxu0 %v129_v18 }
  0x35   :  { %v254_v21 = vld [vmem:[#allocation2 + $0x548] sm:$0xff]  ;;  %v253_v23 = vld [vmem:[#allocation2 + $0x540] sm:$0xff]  ;;  %437 = vmatpush1.msra.mxu1 %v257_v19  ;;  %361 = vmatprep.subr.mxu0 %v126_v20 }
  0x36   :  { %v122_v24 = vld [vmem:[#allocation2 + $0x128] sm:$0xff]  ;;  %438 = vmatprep.subr.mxu1 %v254_v21  ;;  %v121_v26 = vld [vmem:[#allocation2 + $0x120] sm:$0xff]  ;;  %362 = vmatpush1.msra.mxu0 %v125_v22 }
  0x37   :  { %v250_v25 = vld [vmem:[#allocation2 + $0x528] sm:$0xff]  ;;  %v249_v27 = vld [vmem:[#allocation2 + $0x520] sm:$0xff]  ;;  %439 = vmatpush1.msra.mxu1 %v253_v23  ;;  %363 = vmatprep.subr.mxu0 %v122_v24 }
  0x38   :  { %v118_v28 = vld [vmem:[#allocation2 + $0x108] sm:$0xff]  ;;  %440 = vmatprep.subr.mxu1 %v250_v25  ;;  %v117_v30 = vld [vmem:[#allocation2 + $0x100] sm:$0xff]  ;;  %364 = vmatpush1.msra.mxu0 %v121_v26 }
  0x39   :  { %v246_v29 = vld [vmem:[#allocation2 + $0x508] sm:$0xff]  ;;  %v245_v31 = vld [vmem:[#allocation2 + $0x500] sm:$0xff]  ;;  %441 = vmatpush1.msra.mxu1 %v249_v27  ;;  %365 = vmatprep.subr.mxu0 %v118_v28 }
  0x3a   :  { %v114_v32 = vld [vmem:[#allocation2 + $0xe8] sm:$0xff]  ;;  %442 = vmatprep.subr.mxu1 %v246_v29  ;;  %v113_v34 = vld [vmem:[#allocation2 + $0xe0] sm:$0xff]  ;;  %366 = vmatpush1.msra.mxu0 %v117_v30 }
  0x3b   :  { %v242_v33 = vld [vmem:[#allocation2 + $0x4e8] sm:$0xff]  ;;  %v241_v35 = vld [vmem:[#allocation2 + $0x4e0] sm:$0xff]  ;;  %443 = vmatpush1.msra.mxu1 %v245_v31  ;;  %367 = vmatprep.subr.mxu0 %v114_v32  ;;  %v1549_v32 = vld [vmem:[%s1686_s0 + $0x18] sm:$0xff] }
  0x3c   :  { %v110_v36 = vld [vmem:[#allocation2 + $0xc8] sm:$0xff]  ;;  %444 = vmatprep.subr.mxu1 %v242_v33  ;;  %v109_v38 = vld [vmem:[#allocation2 + $0xc0] sm:$0xff]  ;;  %368 = vmatpush1.msra.mxu0 %v113_v34  ;;  %v1554_v34 = vld [vmem:[%s1686_s0 + $0x10] sm:$0xff] }
  0x3d   :  { %v238_v37 = vld [vmem:[#allocation2 + $0x4c8] sm:$0xff]  ;;  %v237_v39 = vld [vmem:[#allocation2 + $0x4c0] sm:$0xff]  ;;  %445 = vmatpush1.msra.mxu1 %v241_v35  ;;  %369 = vmatprep.subr.mxu0 %v110_v36  ;;  %v148_v35 = vld [vmem:[#allocation2 + $0x1f8] sm:$0xff] }
  0x3e   :  { %v106_v40 = vld [vmem:[#allocation2 + $0xa8] sm:$0xff]  ;;  %446 = vmatprep.subr.mxu1 %v238_v37  ;;  %v105_v42 = vld [vmem:[#allocation2 + $0xa0] sm:$0xff]  ;;  %370 = vmatpush1.msra.mxu0 %v109_v38  ;;  %v147_v37 = vld [vmem:[#allocation2 + $0x1f0] sm:$0xff] }
  0x3f   :  { %v234_v41 = vld [vmem:[#allocation2 + $0x4a8] sm:$0xff]  ;;  %v233_v43 = vld [vmem:[#allocation2 + $0x4a0] sm:$0xff]  ;;  %447 = vmatpush1.msra.mxu1 %v237_v39  ;;  %371 = vmatprep.subr.mxu0 %v106_v40  ;;  %v144_v39 = vld [vmem:[#allocation2 + $0x1d8] sm:$0xff] }
  0x40   :  { %v102_v44 = vld [vmem:[#allocation2 + $0x88] sm:$0xff]  ;;  %448 = vmatprep.subr.mxu1 %v234_v41  ;;  %v101_v46 = vld [vmem:[#allocation2 + $0x80] sm:$0xff]  ;;  %372 = vmatpush1.msra.mxu0 %v105_v42  ;;  %v143_v41 = vld [vmem:[#allocation2 + $0x1d0] sm:$0xff] }
  0x41   :  { %v230_v45 = vld [vmem:[#allocation2 + $0x488] sm:$0xff]  ;;  %v229_v47 = vld [vmem:[#allocation2 + $0x480] sm:$0xff]  ;;  %449 = vmatpush1.msra.mxu1 %v233_v43  ;;  %373 = vmatprep.subr.mxu0 %v102_v44  ;;  %v140_v43 = vld [vmem:[#allocation2 + $0x1b8] sm:$0xff] }
  0x42   :  { %v98_v48 = vld [vmem:[#allocation2 + $0x68] sm:$0xff]  ;;  %450 = vmatprep.subr.mxu1 %v230_v45  ;;  %v97_v50 = vld [vmem:[#allocation2 + $0x60] sm:$0xff]  ;;  %374 = vmatpush1.msra.mxu0 %v101_v46  ;;  %v139_v45 = vld [vmem:[#allocation2 + $0x1b0] sm:$0xff] }
  0x43   :  { %v226_v49 = vld [vmem:[#allocation2 + $0x468] sm:$0xff]  ;;  %v225_v51 = vld [vmem:[#allocation2 + $0x460] sm:$0xff]  ;;  %451 = vmatpush1.msra.mxu1 %v229_v47  ;;  %375 = vmatprep.subr.mxu0 %v98_v48  ;;  %v136_v47 = vld [vmem:[#allocation2 + $0x198] sm:$0xff] }
  0x44   :  { %v94_v52 = vld [vmem:[#allocation2 + $0x48] sm:$0xff]  ;;  %452 = vmatprep.subr.mxu1 %v226_v49  ;;  %v93_v54 = vld [vmem:[#allocation2 + $0x40] sm:$0xff]  ;;  %376 = vmatpush1.msra.mxu0 %v97_v50  ;;  %v135_v49 = vld [vmem:[#allocation2 + $0x190] sm:$0xff] }
  0x45   :  { %v222_v53 = vld [vmem:[#allocation2 + $0x448] sm:$0xff]  ;;  %v221_v55 = vld [vmem:[#allocation2 + $0x440] sm:$0xff]  ;;  %453 = vmatpush1.msra.mxu1 %v225_v51  ;;  %377 = vmatprep.subr.mxu0 %v94_v52  ;;  %v132_v51 = vld [vmem:[#allocation2 + $0x178] sm:$0xff] }
  0x46   :  { %v90_v56 = vld [vmem:[#allocation2 + $0x28] sm:$0xff]  ;;  %454 = vmatprep.subr.mxu1 %v222_v53  ;;  %v89_v58 = vld [vmem:[#allocation2 + $0x20] sm:$0xff]  ;;  %378 = vmatpush1.msra.mxu0 %v93_v54  ;;  %v131_v53 = vld [vmem:[#allocation2 + $0x170] sm:$0xff] }
  0x47   :  { %v218_v57 = vld [vmem:[#allocation2 + $0x428] sm:$0xff]  ;;  %v217_v59 = vld [vmem:[#allocation2 + $0x420] sm:$0xff]  ;;  %455 = vmatpush1.msra.mxu1 %v221_v55  ;;  %379 = vmatprep.subr.mxu0 %v90_v56  ;;  %v128_v55 = vld [vmem:[#allocation2 + $0x158] sm:$0xff] }
  0x48   :  { %v86_v60 = vld [vmem:[#allocation2 + $0x8] sm:$0xff]  ;;  %456 = vmatprep.subr.mxu1 %v218_v57  ;;  %v85_v62 = vld [vmem:[#allocation2] sm:$0xff]  ;;  %380 = vmatpush1.msra.mxu0 %v89_v58  ;;  %v127_v57 = vld [vmem:[#allocation2 + $0x150] sm:$0xff] }
  0x49   :  { %v214_v61 = vld [vmem:[#allocation2 + $0x408] sm:$0xff]  ;;  %v213_v63 = vld [vmem:[#allocation2 + $0x400] sm:$0xff]  ;;  %457 = vmatpush1.msra.mxu1 %v217_v59  ;;  %381 = vmatprep.subr.mxu0 %v86_v60  ;;  %v124_v59 = vld [vmem:[#allocation2 + $0x138] sm:$0xff] }
  0x4a   :  { %v210_v0 = vld [vmem:[#allocation2 + $0x3e8] sm:$0xff]  ;;  %458 = vmatprep.subr.mxu1 %v214_v61  ;;  %v209_v2 = vld [vmem:[#allocation2 + $0x3e0] sm:$0xff]  ;;  %382 = vmatpush1.msra.mxu0 %v85_v62  ;;  %v123_v61 = vld [vmem:[#allocation2 + $0x130] sm:$0xff] }
  0x4b   :  { %v306_v1 = vld [vmem:[#allocation2 + $0x6e8] sm:$0x3f]  ;;  %v305_v3 = vld [vmem:[#allocation2 + $0x6e0] sm:$0x3f]  ;;  %459 = vmatpush1.msra.mxu1 %v213_v63  ;;  %383 = vmatprep.subr.mxu0 %v210_v0  ;;  %v120_v63 = vld [vmem:[#allocation2 + $0x118] sm:$0xff] }
  0x4c   :  { %v206_v4 = vld [vmem:[#allocation2 + $0x3c8] sm:$0xff]  ;;  %1218 = vmatprep.subr.msk.mxu1 %vm338_vm0, %v306_v1  ;;  %v205_v6 = vld [vmem:[#allocation2 + $0x3c0] sm:$0xff]  ;;  %384 = vmatpush2.msra.mxu0 %v209_v2  ;;  %v119_v2 = vld [vmem:[#allocation2 + $0x110] sm:$0xff] }
  0x4d   :  { %v302_v5 = vld [vmem:[#allocation2 + $0x6c8] sm:$0xff]  ;;  %v301_v7 = vld [vmem:[#allocation2 + $0x6c0] sm:$0xff]  ;;  %1219 = vmatpush2.msk.msra.mxu1 %vm338_vm0, %v305_v3  ;;  %385 = vmatprep.subr.mxu0 %v206_v4  ;;  %v116_v4 = vld [vmem:[#allocation2 + $0xf8] sm:$0xff] }
  0x4e   :  { %v202_v8 = vld [vmem:[#allocation2 + $0x3a8] sm:$0xff]  ;;  %478 = vmatprep.subr.mxu1 %v302_v5  ;;  %v201_v10 = vld [vmem:[#allocation2 + $0x3a0] sm:$0xff]  ;;  %386 = vmatpush2.msra.mxu0 %v205_v6  ;;  %v276_v5 = vld [vmem:[#allocation2 + $0x5f8] sm:$0xff] }
  0x4f   :  { %v298_v9 = vld [vmem:[#allocation2 + $0x6a8] sm:$0xff]  ;;  %v297_v11 = vld [vmem:[#allocation2 + $0x6a0] sm:$0xff]  ;;  %479 = vmatpush2.msra.mxu1 %v301_v7  ;;  %387 = vmatprep.subr.mxu0 %v202_v8  ;;  %v115_v6 = vld [vmem:[#allocation2 + $0xf0] sm:$0xff] }
  0x50   :  { %v198_v12 = vld [vmem:[#allocation2 + $0x388] sm:$0xff]  ;;  %480 = vmatprep.subr.mxu1 %v298_v9  ;;  %v197_v14 = vld [vmem:[#allocation2 + $0x380] sm:$0xff]  ;;  %388 = vmatpush2.msra.mxu0 %v201_v10  ;;  %v275_v7 = vld [vmem:[#allocation2 + $0x5f0] sm:$0xff] }
  0x51   :  { %v294_v13 = vld [vmem:[#allocation2 + $0x688] sm:$0xff]  ;;  %v293_v15 = vld [vmem:[#allocation2 + $0x680] sm:$0xff]  ;;  %481 = vmatpush2.msra.mxu1 %v297_v11  ;;  %389 = vmatprep.subr.mxu0 %v198_v12  ;;  %v112_v8 = vld [vmem:[#allocation2 + $0xd8] sm:$0xff] }
  0x52   :  { %v194_v16 = vld [vmem:[#allocation2 + $0x368] sm:$0xff]  ;;  %482 = vmatprep.subr.mxu1 %v294_v13  ;;  %v193_v18 = vld [vmem:[#allocation2 + $0x360] sm:$0xff]  ;;  %390 = vmatpush2.msra.mxu0 %v197_v14  ;;  %v272_v9 = vld [vmem:[#allocation2 + $0x5d8] sm:$0xff] }
  0x53   :  { %v290_v17 = vld [vmem:[#allocation2 + $0x668] sm:$0xff]  ;;  %v289_v19 = vld [vmem:[#allocation2 + $0x660] sm:$0xff]  ;;  %483 = vmatpush2.msra.mxu1 %v293_v15  ;;  %391 = vmatprep.subr.mxu0 %v194_v16  ;;  %v111_v10 = vld [vmem:[#allocation2 + $0xd0] sm:$0xff] }
  0x54   :  { %v190_v20 = vld [vmem:[#allocation2 + $0x348] sm:$0xff]  ;;  %484 = vmatprep.subr.mxu1 %v290_v17  ;;  %v189_v22 = vld [vmem:[#allocation2 + $0x340] sm:$0xff]  ;;  %392 = vmatpush2.msra.mxu0 %v193_v18  ;;  %v271_v11 = vld [vmem:[#allocation2 + $0x5d0] sm:$0xff] }
  0x55   :  { %v286_v21 = vld [vmem:[#allocation2 + $0x648] sm:$0xff]  ;;  %v285_v23 = vld [vmem:[#allocation2 + $0x640] sm:$0xff]  ;;  %485 = vmatpush2.msra.mxu1 %v289_v19  ;;  %393 = vmatprep.subr.mxu0 %v190_v20  ;;  %v108_v12 = vld [vmem:[#allocation2 + $0xb8] sm:$0xff] }
  0x56   :  { %v186_v24 = vld [vmem:[#allocation2 + $0x328] sm:$0xff]  ;;  %486 = vmatprep.subr.mxu1 %v286_v21  ;;  %v185_v26 = vld [vmem:[#allocation2 + $0x320] sm:$0xff]  ;;  %394 = vmatpush2.msra.mxu0 %v189_v22  ;;  %v268_v13 = vld [vmem:[#allocation2 + $0x5b8] sm:$0xff] }
  0x57   :  { %v282_v25 = vld [vmem:[#allocation2 + $0x628] sm:$0xff]  ;;  %v281_v27 = vld [vmem:[#allocation2 + $0x620] sm:$0xff]  ;;  %487 = vmatpush2.msra.mxu1 %v285_v23  ;;  %395 = vmatprep.subr.mxu0 %v186_v24  ;;  %v107_v14 = vld [vmem:[#allocation2 + $0xb0] sm:$0xff] }
  0x58   :  { %v182_v28 = vld [vmem:[#allocation2 + $0x308] sm:$0xff]  ;;  %488 = vmatprep.subr.mxu1 %v282_v25  ;;  %v181_v30 = vld [vmem:[#allocation2 + $0x300] sm:$0xff]  ;;  %396 = vmatpush2.msra.mxu0 %v185_v26  ;;  %v267_v15 = vld [vmem:[#allocation2 + $0x5b0] sm:$0xff] }
  0x59   :  { %v278_v29 = vld [vmem:[#allocation2 + $0x608] sm:$0xff]  ;;  %v277_v31 = vld [vmem:[#allocation2 + $0x600] sm:$0xff]  ;;  %489 = vmatpush2.msra.mxu1 %v281_v27  ;;  %397 = vmatprep.subr.mxu0 %v182_v28  ;;  %v104_v16 = vld [vmem:[#allocation2 + $0x98] sm:$0xff] }
  0x5a   :  { %v178_v33 = vld [vmem:[#allocation2 + $0x2e8] sm:$0xff]  ;;  %490 = vmatprep.subr.mxu1 %v278_v29  ;;  %398 = vmatpush2.msra.mxu0 %v181_v30  ;;  %v177_v36 = vld [vmem:[#allocation2 + $0x2e0] sm:$0xff]  ;;  %v264_v17 = vld [vmem:[#allocation2 + $0x598] sm:$0xff] }
  0x5b   :  { %491 = vmatpush2.msra.mxu1 %v277_v31  ;;  %1220 = vmatprep.mubr.msk.f32.mxu1 %vm331_vm1, %v1549_v32  ;;  %v174_v38 = vld [vmem:[#allocation2 + $0x2c8] sm:$0xff]  ;;  %v173_v40 = vld [vmem:[#allocation2 + $0x2c0] sm:$0xff]  ;;  %v103_v18 = vld [vmem:[#allocation2 + $0x90] sm:$0xff] }
  0x5c   :  { %399 = vmatprep.subr.mxu0 %v178_v33  ;;  %493 = vmatmul.mubr.f32.vlgmr.msra.gmra.mxu1 %v1554_v34  ;;  %v170_v42 = vld [vmem:[#allocation2 + $0x2a8] sm:$0xff]  ;;  %v169_v44 = vld [vmem:[#allocation2 + $0x2a0] sm:$0xff]  ;;  %v263_v19 = vld [vmem:[#allocation2 + $0x590] sm:$0xff] }
  0x5d   :  { %505 = vmatprep.subr.mxu1 %v148_v35  ;;  %400 = vmatpush2.msra.mxu0 %v177_v36  ;;  %v166_v46 = vld [vmem:[#allocation2 + $0x288] sm:$0xff]  ;;  %v165_v48 = vld [vmem:[#allocation2 + $0x280] sm:$0xff]  ;;  %v100_v20 = vld [vmem:[#allocation2 + $0x78] sm:$0xff] }
  0x5e   :  { %506 = vmatpush1.msra.mxu1 %v147_v37  ;;  %401 = vmatprep.subr.mxu0 %v174_v38  ;;  %v162_v50 = vld [vmem:[#allocation2 + $0x268] sm:$0xff]  ;;  %v161_v52 = vld [vmem:[#allocation2 + $0x260] sm:$0xff]  ;;  %v260_v21 = vld [vmem:[#allocation2 + $0x578] sm:$0xff] }
  0x5f   :  { %507 = vmatprep.subr.mxu1 %v144_v39  ;;  %402 = vmatpush2.msra.mxu0 %v173_v40  ;;  %v158_v54 = vld [vmem:[#allocation2 + $0x248] sm:$0xff]  ;;  %v157_v56 = vld [vmem:[#allocation2 + $0x240] sm:$0xff]  ;;  %v99_v22 = vld [vmem:[#allocation2 + $0x70] sm:$0xff] }
  0x60   :  { %508 = vmatpush1.msra.mxu1 %v143_v41  ;;  %403 = vmatprep.subr.mxu0 %v170_v42  ;;  %v154_v58 = vld [vmem:[#allocation2 + $0x228] sm:$0xff]  ;;  %v153_v60 = vld [vmem:[#allocation2 + $0x220] sm:$0xff]  ;;  %v259_v23 = vld [vmem:[#allocation2 + $0x570] sm:$0xff] }
  0x61   :  { %509 = vmatprep.subr.mxu1 %v140_v43  ;;  %404 = vmatpush2.msra.mxu0 %v169_v44  ;;  %v150_v62 = vld [vmem:[#allocation2 + $0x208] sm:$0xff]  ;;  %v149_v0 = vld [vmem:[#allocation2 + $0x200] sm:$0xff]  ;;  %v96_v24 = vld [vmem:[#allocation2 + $0x58] sm:$0xff] }
  0x62   :  { %510 = vmatpush1.msra.mxu1 %v139_v45  ;;  %405 = vmatprep.subr.mxu0 %v166_v46  ;;  %v1562_v1 = vld [vmem:[%s1686_s0 + $0x8] sm:$0xff]  ;;  %v1567_v3 = vld [vmem:[%s1686_s0] sm:$0xff]  ;;  %v256_v25 = vld [vmem:[#allocation2 + $0x558] sm:$0xff] }
  0x63   :  { %511 = vmatprep.subr.mxu1 %v136_v47  ;;  %406 = vmatpush2.msra.mxu0 %v165_v48  ;;  %v95_v26 = vld [vmem:[#allocation2 + $0x50] sm:$0xff]  ;;  %v92_v28 = vld [vmem:[#allocation2 + $0x38] sm:$0xff] }
  0x64   :  { %512 = vmatpush1.msra.mxu1 %v135_v49  ;;  %407 = vmatprep.subr.mxu0 %v162_v50  ;;  %v255_v27 = vld [vmem:[#allocation2 + $0x550] sm:$0xff]  ;;  %v252_v29 = vld [vmem:[#allocation2 + $0x538] sm:$0xff] }
  0x65   :  { %513 = vmatprep.subr.mxu1 %v132_v51  ;;  %408 = vmatpush2.msra.mxu0 %v161_v52  ;;  %v91_v30 = vld [vmem:[#allocation2 + $0x30] sm:$0xff]  ;;  %v88_v33 = vld [vmem:[#allocation2 + $0x18] sm:$0xff] }
  0x66   :  { %514 = vmatpush1.msra.mxu1 %v131_v53  ;;  %409 = vmatprep.subr.mxu0 %v158_v54  ;;  %v251_v31 = vld [vmem:[#allocation2 + $0x530] sm:$0xff]  ;;  %v248_v35 = vld [vmem:[#allocation2 + $0x518] sm:$0xff] }
  0x67   :  { %515 = vmatprep.subr.mxu1 %v128_v55  ;;  %410 = vmatpush2.msra.mxu0 %v157_v56  ;;  %v87_v36 = vld [vmem:[#allocation2 + $0x10] sm:$0xff]  ;;  %v212_v38 = vld [vmem:[#allocation2 + $0x3f8] sm:$0xff] }
  0x68   :  { %516 = vmatpush1.msra.mxu1 %v127_v57  ;;  %411 = vmatprep.subr.mxu0 %v154_v58  ;;  %v247_v37 = vld [vmem:[#allocation2 + $0x510] sm:$0xff]  ;;  %v244_v39 = vld [vmem:[#allocation2 + $0x4f8] sm:$0xff] }
  0x69   :  { %517 = vmatprep.subr.mxu1 %v124_v59  ;;  %412 = vmatpush2.msra.mxu0 %v153_v60  ;;  %v211_v40 = vld [vmem:[#allocation2 + $0x3f0] sm:$0xff]  ;;  %v208_v42 = vld [vmem:[#allocation2 + $0x3d8] sm:$0xff] }
  0x6a   :  { %518 = vmatpush1.msra.mxu1 %v123_v61  ;;  %413 = vmatprep.subr.mxu0 %v150_v62  ;;  %v243_v41 = vld [vmem:[#allocation2 + $0x4f0] sm:$0xff]  ;;  %v240_v43 = vld [vmem:[#allocation2 + $0x4d8] sm:$0xff] }
  0x6b   :  { %519 = vmatprep.subr.mxu1 %v120_v63  ;;  %414 = vmatpush2.msra.mxu0 %v149_v0  ;;  %v207_v44 = vld [vmem:[#allocation2 + $0x3d0] sm:$0xff]  ;;  %v204_v46 = vld [vmem:[#allocation2 + $0x3b8] sm:$0xff] }
  0x6c   :  { %415 = vmatprep.mubr.f32.mxu0 %v1562_v1  ;;  %520 = vmatpush1.msra.mxu1 %v119_v2  ;;  %v239_v45 = vld [vmem:[#allocation2 + $0x4d0] sm:$0xff]  ;;  %v236_v47 = vld [vmem:[#allocation2 + $0x4b8] sm:$0xff] }
  0x6d   :  { %416 = vmatmul.mubr.f32.vlgmr.msra.gmra.mxu0 %v1567_v3  ;;  %521 = vmatprep.subr.mxu1 %v116_v4  ;;  %v203_v48 = vld [vmem:[#allocation2 + $0x3b0] sm:$0xff]  ;;  %v200_v50 = vld [vmem:[#allocation2 + $0x398] sm:$0xff] }
  0x6e   :  { %582 = vmatprep.subr.mxu0 %v276_v5  ;;  %522 = vmatpush1.msra.mxu1 %v115_v6  ;;  %v235_v49 = vld [vmem:[#allocation2 + $0x4b0] sm:$0xff]  ;;  %v232_v51 = vld [vmem:[#allocation2 + $0x498] sm:$0xff] }
  0x6f   :  { %583 = vmatpush1.msra.mxu0 %v275_v7  ;;  %523 = vmatprep.subr.mxu1 %v112_v8  ;;  %v199_v52 = vld [vmem:[#allocation2 + $0x390] sm:$0xff]  ;;  %v196_v54 = vld [vmem:[#allocation2 + $0x378] sm:$0xff] }
  0x70   :  { %584 = vmatprep.subr.mxu0 %v272_v9  ;;  %524 = vmatpush1.msra.mxu1 %v111_v10  ;;  %v231_v53 = vld [vmem:[#allocation2 + $0x490] sm:$0xff]  ;;  %v228_v55 = vld [vmem:[#allocation2 + $0x478] sm:$0xff] }
  0x71   :  { %585 = vmatpush1.msra.mxu0 %v271_v11  ;;  %525 = vmatprep.subr.mxu1 %v108_v12  ;;  %v195_v56 = vld [vmem:[#allocation2 + $0x370] sm:$0xff]  ;;  %v192_v58 = vld [vmem:[#allocation2 + $0x358] sm:$0xff] }
  0x72   :  { %586 = vmatprep.subr.mxu0 %v268_v13  ;;  %526 = vmatpush1.msra.mxu1 %v107_v14  ;;  %v227_v57 = vld [vmem:[#allocation2 + $0x470] sm:$0xff]  ;;  %v224_v59 = vld [vmem:[#allocation2 + $0x458] sm:$0xff] }
  0x73   :  { %587 = vmatpush1.msra.mxu0 %v267_v15  ;;  %527 = vmatprep.subr.mxu1 %v104_v16  ;;  %v191_v60 = vld [vmem:[#allocation2 + $0x350] sm:$0xff]  ;;  %v188_v62 = vld [vmem:[#allocation2 + $0x338] sm:$0xff]  ;;  %v1576_v16 = vld [vmem:[%s1686_s0 + $0x28] sm:$0xff] }
  0x74   :  { %588 = vmatprep.subr.mxu0 %v264_v17  ;;  %528 = vmatpush1.msra.mxu1 %v103_v18  ;;  %v223_v61 = vld [vmem:[#allocation2 + $0x450] sm:$0xff]  ;;  %v220_v63 = vld [vmem:[#allocation2 + $0x438] sm:$0xff] }
  0x75   :  { %589 = vmatpush1.msra.mxu0 %v263_v19  ;;  %529 = vmatprep.subr.mxu1 %v100_v20  ;;  %v187_v0 = vld [vmem:[#allocation2 + $0x330] sm:$0xff]  ;;  %v184_v4 = vld [vmem:[#allocation2 + $0x318] sm:$0xff]  ;;  %v1581_v19 = vld [vmem:[%s1686_s0 + $0x20] sm:$0xff] }
  0x76   :  { %590 = vmatprep.subr.mxu0 %v260_v21  ;;  %530 = vmatpush1.msra.mxu1 %v99_v22  ;;  %v219_v2 = vld [vmem:[#allocation2 + $0x430] sm:$0xff]  ;;  %v216_v5 = vld [vmem:[#allocation2 + $0x418] sm:$0xff] }
  0x77   :  { %591 = vmatpush1.msra.mxu0 %v259_v23  ;;  %531 = vmatprep.subr.mxu1 %v96_v24  ;;  %v183_v6 = vld [vmem:[#allocation2 + $0x310] sm:$0xff]  ;;  %v180_v8 = vld [vmem:[#allocation2 + $0x2f8] sm:$0xff] }
  0x78   :  { %592 = vmatprep.subr.mxu0 %v256_v25  ;;  %532 = vmatpush1.msra.mxu1 %v95_v26  ;;  %v215_v7 = vld [vmem:[#allocation2 + $0x410] sm:$0xff]  ;;  %v308_v9 = vld [vmem:[#allocation2 + $0x6f8] sm:$0x3f] }
  0x79   :  { %593 = vmatpush1.msra.mxu0 %v255_v27  ;;  %533 = vmatprep.subr.mxu1 %v92_v28  ;;  %v179_v10 = vld [vmem:[#allocation2 + $0x2f0] sm:$0xff]  ;;  %v176_v12 = vld [vmem:[#allocation2 + $0x2d8] sm:$0xff] }
  0x7a   :  { %594 = vmatprep.subr.mxu0 %v252_v29  ;;  %534 = vmatpush1.msra.mxu1 %v91_v30  ;;  %v307_v11 = vld [vmem:[#allocation2 + $0x6f0] sm:$0x3f]  ;;  %v304_v13 = vld [vmem:[#allocation2 + $0x6d8] sm:$0xff] }
  0x7b   :  { %595 = vmatpush1.msra.mxu0 %v251_v31  ;;  %535 = vmatprep.subr.mxu1 %v88_v33  ;;  %v175_v14 = vld [vmem:[#allocation2 + $0x2d0] sm:$0xff]  ;;  %v172_v17 = vld [vmem:[#allocation2 + $0x2b8] sm:$0xff] }
  0x7c   :  { %596 = vmatprep.subr.mxu0 %v248_v35  ;;  %536 = vmatpush1.msra.mxu1 %v87_v36  ;;  %v303_v15 = vld [vmem:[#allocation2 + $0x6d0] sm:$0xff]  ;;  %v300_v18 = vld [vmem:[#allocation2 + $0x6b8] sm:$0xff] }
  0x7d   :  { %597 = vmatpush1.msra.mxu0 %v247_v37  ;;  %537 = vmatprep.subr.mxu1 %v212_v38  ;;  %v171_v20 = vld [vmem:[#allocation2 + $0x2b0] sm:$0xff]  ;;  %v84_v22 = vld [vmem:[%s1686_s0 + $0x38] sm:$0xff] }
  0x7e   :  { %598 = vmatprep.subr.mxu0 %v244_v39  ;;  %538 = vmatpush2.msra.mxu1 %v211_v40  ;;  %v299_v21 = vld [vmem:[#allocation2 + $0x6b0] sm:$0xff]  ;;  %v168_v23 = vld [vmem:[#allocation2 + $0x298] sm:$0xff] }
  0x7f   :  { %599 = vmatpush1.msra.mxu0 %v243_v41  ;;  %539 = vmatprep.subr.mxu1 %v208_v42  ;;  %v296_v24 = vld [vmem:[#allocation2 + $0x698] sm:$0xff]  ;;  %v83_v25 = vld [vmem:[%s1686_s0 + $0x30] sm:$0xff] }
  0x80   :  { %600 = vmatprep.subr.mxu0 %v240_v43  ;;  %540 = vmatpush2.msra.mxu1 %v207_v44  ;;  %v167_v26 = vld [vmem:[#allocation2 + $0x290] sm:$0xff]  ;;  %v164_v28 = vld [vmem:[#allocation2 + $0x278] sm:$0xff] }
  0x81   :  { %601 = vmatpush1.msra.mxu0 %v239_v45  ;;  %541 = vmatprep.subr.mxu1 %v204_v46  ;;  %v295_v27 = vld [vmem:[#allocation2 + $0x690] sm:$0xff]  ;;  %v292_v29 = vld [vmem:[#allocation2 + $0x678] sm:$0xff] }
  0x82   :  { %602 = vmatprep.subr.mxu0 %v236_v47  ;;  %542 = vmatpush2.msra.mxu1 %v203_v48  ;;  %v163_v30 = vld [vmem:[#allocation2 + $0x270] sm:$0xff]  ;;  %v160_v33 = vld [vmem:[#allocation2 + $0x258] sm:$0xff]  ;;  %v696_v48 = vld [vmem:[#allocation5 + $0xe8] sm:$0xff] }
  0x83   :  { %603 = vmatpush1.msra.mxu0 %v235_v49  ;;  %543 = vmatprep.subr.mxu1 %v200_v50  ;;  %v291_v31 = vld [vmem:[#allocation2 + $0x670] sm:$0xff]  ;;  %v288_v35 = vld [vmem:[#allocation2 + $0x658] sm:$0xff]  ;;  %v695_v49 = vld [vmem:[#allocation5 + $0xe0] sm:$0xff] }
  0x84   :  { %604 = vmatprep.subr.mxu0 %v232_v51  ;;  %544 = vmatpush2.msra.mxu1 %v199_v52  ;;  %v159_v36 = vld [vmem:[#allocation2 + $0x250] sm:$0xff]  ;;  %v156_v38 = vld [vmem:[#allocation2 + $0x238] sm:$0xff]  ;;  %v692_v50 = vld [vmem:[#allocation5 + $0xc8] sm:$0xff] }
  0x85   :  { %605 = vmatpush1.msra.mxu0 %v231_v53  ;;  %545 = vmatprep.subr.mxu1 %v196_v54  ;;  %v287_v37 = vld [vmem:[#allocation2 + $0x650] sm:$0xff]  ;;  %v284_v39 = vld [vmem:[#allocation2 + $0x638] sm:$0xff]  ;;  %v688_v52 = vld [vmem:[#allocation5 + $0xa8] sm:$0xff] }
  0x86   :  { %606 = vmatprep.subr.mxu0 %v228_v55  ;;  %546 = vmatpush2.msra.mxu1 %v195_v56  ;;  %v155_v40 = vld [vmem:[#allocation2 + $0x230] sm:$0xff]  ;;  %v152_v42 = vld [vmem:[#allocation2 + $0x218] sm:$0xff]  ;;  %v687_v53 = vld [vmem:[#allocation5 + $0xa0] sm:$0xff] }
  0x87   :  { %607 = vmatpush1.msra.mxu0 %v227_v57  ;;  %547 = vmatprep.subr.mxu1 %v192_v58  ;;  %v283_v41 = vld [vmem:[#allocation2 + $0x630] sm:$0xff]  ;;  %v280_v43 = vld [vmem:[#allocation2 + $0x618] sm:$0xff]  ;;  %v684_v56 = vld [vmem:[#allocation5 + $0x88] sm:$0xff] }
  0x88   :  { %608 = vmatprep.subr.mxu0 %v224_v59  ;;  %548 = vmatpush2.msra.mxu1 %v191_v60  ;;  %v151_v44 = vld [vmem:[#allocation2 + $0x210] sm:$0xff]  ;;  %v698_v46 = vld [vmem:[#allocation5 + $0xf8] sm:$0xff]  ;;  %v683_v57 = vld [vmem:[#allocation5 + $0x80] sm:$0xff] }
  0x89   :  { %609 = vmatpush1.msra.mxu0 %v223_v61  ;;  %549 = vmatprep.subr.mxu1 %v188_v62  ;;  %v279_v45 = vld [vmem:[#allocation2 + $0x610] sm:$0xff]  ;;  %v686_v54 = vld [vmem:[#allocation5 + $0x98] sm:$0xff]  ;;  %v680_v60 = vld [vmem:[#allocation5 + $0x68] sm:$0xff] }
  0x8a   :  { %610 = vmatprep.subr.mxu0 %v220_v63  ;;  %550 = vmatpush2.msra.mxu1 %v187_v0  ;;  %v697_v47 = vld [vmem:[#allocation5 + $0xf0] sm:$0xff]  ;;  %v682_v58 = vld [vmem:[#allocation5 + $0x78] sm:$0xff]  ;;  %v679_v61 = vld [vmem:[#allocation5 + $0x60] sm:$0xff] }
  0x8b   :  { %611 = vmatpush1.msra.mxu0 %v219_v2  ;;  %551 = vmatprep.subr.mxu1 %v184_v4  ;;  %v689_v51 = vld [vmem:[#allocation5 + $0xb0] sm:$0xff]  ;;  %v678_v62 = vld [vmem:[#allocation5 + $0x58] sm:$0xff]  ;;  %v760_v4 = vld [vmem:[#allocation5 + $0x2e8] sm:$0xff] }
  0x8c   :  { %612 = vmatprep.subr.mxu0 %v216_v5  ;;  %552 = vmatpush2.msra.mxu1 %v183_v6  ;;  %v685_v55 = vld [vmem:[#allocation5 + $0x90] sm:$0xff]  ;;  %v762_v63 = vld [vmem:[#allocation5 + $0x2f8] sm:$0xff]  ;;  %v676_v5 = vld [vmem:[#allocation5 + $0x48] sm:$0xff] }
  0x8d   :  { %613 = vmatpush1.msra.mxu0 %v215_v7  ;;  %553 = vmatprep.subr.mxu1 %v180_v8  ;;  %v681_v59 = vld [vmem:[#allocation5 + $0x70] sm:$0xff]  ;;  %v759_v6 = vld [vmem:[#allocation5 + $0x2e0] sm:$0xff]  ;;  %v758_v7 = vld [vmem:[#allocation5 + $0x2d8] sm:$0xff] }
  0x8e   :  { %1222 = vmatprep.subr.msk.mxu0 %vm338_vm0, %v308_v9  ;;  %554 = vmatpush2.msra.mxu1 %v179_v10  ;;  %v761_v0 = vld [vmem:[#allocation5 + $0x2f0] sm:$0xff]  ;;  %v675_v8 = vld [vmem:[#allocation5 + $0x40] sm:$0xff]  ;;  %v674_v10 = vld [vmem:[#allocation5 + $0x38] sm:$0xff] }
  0x8f   :  { %1223 = vmatpush2.msk.msra.mxu0 %vm338_vm0, %v307_v11  ;;  %555 = vmatprep.subr.mxu1 %v176_v12  ;;  %v677_v2 = vld [vmem:[#allocation5 + $0x50] sm:$0xff]  ;;  %v756_v11 = vld [vmem:[#allocation5 + $0x2c8] sm:$0xff] }
  0x90   :  { %632 = vmatprep.subr.mxu0 %v304_v13  ;;  %556 = vmatpush2.msra.mxu1 %v175_v14  ;;  %v757_v9 = vld [vmem:[#allocation5 + $0x2d0] sm:$0xff]  ;;  %v755_v13 = vld [vmem:[#allocation5 + $0x2c0] sm:$0xff]  ;;  %v672_v14 = vld [vmem:[#allocation5 + $0x28] sm:$0xff] }
  0x91   :  { %633 = vmatpush2.msra.mxu0 %v303_v15  ;;  %421 = vmatprep.mubr.f32.mxu0 %v1576_v16  ;;  %v673_v12 = vld [vmem:[#allocation5 + $0x30] sm:$0xff]  ;;  %v754_v15 = vld [vmem:[#allocation5 + $0x2b8] sm:$0xff] }
  0x92   :  { %557 = vmatprep.subr.mxu1 %v172_v17  ;;  %634 = vmatprep.subr.mxu0 %v300_v18  ;;  %v753_v17 = vld [vmem:[#allocation5 + $0x2b0] sm:$0xff]  ;;  %v670_v18 = vld [vmem:[#allocation5 + $0x18] sm:$0xff] }
  0x93   :  { %422 = vmatmul.mubr.f32.gmra.mxu0 %v1581_v19  ;;  %558 = vmatpush2.msra.mxu1 %v171_v20  ;;  %v669_v20 = vld [vmem:[#allocation5 + $0x10] sm:$0xff] }
  0x94   :  { %635 = vmatpush2.msra.mxu0 %v299_v21  ;;  %1221 = vmatprep.mubr.msk.f32.mxu1 %vm331_vm1, %v84_v22  ;;  %v751_v21 = vld [vmem:[#allocation5 + $0x2a0] sm:$0xff] }
  0x95   :  { %559 = vmatprep.subr.mxu1 %v168_v23  ;;  %636 = vmatprep.subr.mxu0 %v296_v24  ;;  %v750_v23 = vld [vmem:[#allocation5 + $0x298] sm:$0xff]  ;;  %v667_v24 = vld [vmem:[#allocation5] sm:$0xff] }
  0x96   :  { %499 = vmatmul.mubr.f32.gmra.mxu1 %v83_v25  ;;  %637 = vmatpush2.msra.mxu0 %v295_v27  ;;  %v748_v27 = vld [vmem:[#allocation5 + $0x288] sm:$0xff] }
  0x97   :  { %560 = vmatpush2.msra.mxu1 %v167_v26  ;;  %638 = vmatprep.subr.mxu0 %v292_v29  ;;  %v730_v26 = vld [vmem:[#allocation5 + $0x1f8] sm:$0xff]  ;;  %v747_v29 = vld [vmem:[#allocation5 + $0x280] sm:$0xff] }
  0x98   :  { %561 = vmatprep.subr.mxu1 %v164_v28  ;;  %639 = vmatpush2.msra.mxu0 %v291_v31  ;;  %v729_v28 = vld [vmem:[#allocation5 + $0x1f0] sm:$0xff]  ;;  %v746_v31 = vld [vmem:[#allocation5 + $0x278] sm:$0xff] }
  0x99   :  { %562 = vmatpush2.msra.mxu1 %v163_v30  ;;  %640 = vmatprep.subr.mxu0 %v288_v35  ;;  %v728_v30 = vld [vmem:[#allocation5 + $0x1e8] sm:$0xff]  ;;  %v745_v35 = vld [vmem:[#allocation5 + $0x270] sm:$0xff] }
  0x9a   :  { %563 = vmatprep.subr.mxu1 %v160_v33  ;;  %641 = vmatpush2.msra.mxu0 %v287_v37  ;;  %v727_v33 = vld [vmem:[#allocation5 + $0x1e0] sm:$0xff]  ;;  %v744_v37 = vld [vmem:[#allocation5 + $0x268] sm:$0xff] }
  0x9b   :  { %564 = vmatpush2.msra.mxu1 %v159_v36  ;;  %642 = vmatprep.subr.mxu0 %v284_v39  ;;  %v726_v36 = vld [vmem:[#allocation5 + $0x1d8] sm:$0xff]  ;;  %v743_v39 = vld [vmem:[#allocation5 + $0x260] sm:$0xff] }
  0x9c   :  { %565 = vmatprep.subr.mxu1 %v156_v38  ;;  %643 = vmatpush2.msra.mxu0 %v283_v41  ;;  %v725_v38 = vld [vmem:[#allocation5 + $0x1d0] sm:$0xff]  ;;  %v742_v41 = vld [vmem:[#allocation5 + $0x258] sm:$0xff] }
  0x9d   :  { %566 = vmatpush2.msra.mxu1 %v155_v40  ;;  %644 = vmatprep.subr.mxu0 %v280_v43  ;;  %v724_v40 = vld [vmem:[#allocation5 + $0x1c8] sm:$0xff]  ;;  %v741_v43 = vld [vmem:[#allocation5 + $0x250] sm:$0xff] }
  0x9e   :  { %567 = vmatprep.subr.mxu1 %v152_v42  ;;  %569 = vmatprep.mubr.f32.mxu1 %v1562_v1  ;;  %v694_v1 = vld [vmem:[#allocation5 + $0xd8] sm:$0xff]  ;;  %v723_v42 = vld [vmem:[#allocation5 + $0x1c0] sm:$0xff] }
  0x9f   :  { %568 = vmatpush2.msra.mxu1 %v151_v44  ;;  %645 = vmatpush2.msra.mxu0 %v279_v45  ;;  %v722_v44 = vld [vmem:[#allocation5 + $0x1b8] sm:$0xff]  ;;  %v740_v45 = vld [vmem:[#allocation5 + $0x248] sm:$0xff] }
  0xa0   :  { %1224 = vmatprep.mubr.msk.f32.mxu0 %vm331_vm1, %v1549_v32  ;;  %570 = vmatmul.mubr.f32.vlgmr.msra.gmra.mxu1 %v1567_v3  ;;  %v693_v32 = vld [vmem:[#allocation5 + $0xd0] sm:$0xff]  ;;  %v691_v3 = vld [vmem:[#allocation5 + $0xc0] sm:$0xff] }
  0xa1   :  { %647 = vmatmul.mubr.f32.vlgmr.msra.gmra.mxu0 %v1554_v34  ;;  %575 = vmatprep.mubr.f32.mxu1 %v1576_v16  ;;  %v690_v34 = vld [vmem:[#allocation5 + $0xb8] sm:$0xff]  ;;  %v671_v16 = vld [vmem:[#allocation5 + $0x20] sm:$0xff] }
  0xa2   :  { %1225 = vmatprep.mubr.msk.f32.mxu0 %vm331_vm1, %v84_v22  ;;  %807 = vmatprep.subr.mxu0 %v698_v46  ;;  %v668_v22 = vld [vmem:[#allocation5 + $0x8] sm:$0xff]  ;;  %v721_v46 = vld [vmem:[#allocation5 + $0x1b0] sm:$0xff] }
  0xa3   :  { %808 = vmatpush1.msra.mxu0 %v697_v47  ;;  %884 = vmatprep.subr.mxu1 %v762_v63  ;;  %v739_v47 = vld [vmem:[#allocation5 + $0x240] sm:$0xff]  ;;  %v710_v63 = vld [vmem:[#allocation5 + $0x158] sm:$0xff] }
  0xa4   :  { %576 = vmatmul.mubr.f32.gmra.mxu1 %v1581_v19  ;;  %809 = vmatprep.subr.mxu0 %v696_v48  ;;  %v752_v19 = vld [vmem:[#allocation5 + $0x2a8] sm:$0xff] }
  0xa5   :  { %653 = vmatmul.mubr.f32.gmra.mxu0 %v83_v25  ;;  %885 = vmatpush1.msra.mxu1 %v761_v0  ;;  %v749_v25 = vld [vmem:[#allocation5 + $0x290] sm:$0xff]  ;;  %v720_v48 = vld [vmem:[#allocation5 + $0x1a8] sm:$0xff] }
  0xa6   :  { %810 = vmatpush1.msra.mxu0 %v695_v49  ;;  %886 = vmatprep.subr.mxu1 %v760_v4  ;;  %v738_v49 = vld [vmem:[#allocation5 + $0x238] sm:$0xff]  ;;  %v709_v0 = vld [vmem:[#allocation5 + $0x150] sm:$0xff] }
  0xa7   :  { %811 = vmatprep.subr.mxu0 %v694_v1  ;;  %887 = vmatpush1.msra.mxu1 %v759_v6  ;;  %v719_v1 = vld [vmem:[#allocation5 + $0x1a0] sm:$0xff]  ;;  %v793_v4 = vld [vmem:[#allocation5 + $0x3f0] sm:$0xff]  ;;  %v792_v6 = vld [vmem:[#allocation5 + $0x3e8] sm:$0xff] }
  0xa8   :  { %812 = vmatpush1.msra.mxu0 %v693_v32  ;;  %888 = vmatprep.subr.mxu1 %v758_v7  ;;  %v737_v32 = vld [vmem:[#allocation5 + $0x230] sm:$0xff]  ;;  %v706_v7 = vld [vmem:[#allocation5 + $0x138] sm:$0xff] }
  0xa9   :  { %813 = vmatprep.subr.mxu0 %v692_v50  ;;  %889 = vmatpush1.msra.mxu1 %v757_v9  ;;  %v718_v50 = vld [vmem:[#allocation5 + $0x198] sm:$0xff]  ;;  %v705_v9 = vld [vmem:[#allocation5 + $0x130] sm:$0xff] }
  0xaa   :  { %814 = vmatpush1.msra.mxu0 %v691_v3  ;;  %890 = vmatprep.subr.mxu1 %v756_v11  ;;  %v736_v3 = vld [vmem:[#allocation5 + $0x228] sm:$0xff]  ;;  %v790_v11 = vld [vmem:[#allocation5 + $0x3d8] sm:$0xff] }
  0xab   :  { %815 = vmatprep.subr.mxu0 %v690_v34  ;;  %891 = vmatpush1.msra.mxu1 %v755_v13  ;;  %v717_v34 = vld [vmem:[#allocation5 + $0x190] sm:$0xff]  ;;  %v788_v13 = vld [vmem:[#allocation5 + $0x3c8] sm:$0xff] }
  0xac   :  { %816 = vmatpush1.msra.mxu0 %v689_v51  ;;  %892 = vmatprep.subr.mxu1 %v754_v15  ;;  %v735_v51 = vld [vmem:[#allocation5 + $0x220] sm:$0xff] }
  0xad   :  { %817 = vmatprep.subr.mxu0 %v688_v52  ;;  %893 = vmatpush1.msra.mxu1 %v753_v17  ;;  %v716_v52 = vld [vmem:[#allocation5 + $0x188] sm:$0xff]  ;;  %v703_v15 = vld [vmem:[#allocation5 + $0x120] sm:$0xff]  ;;  %v702_v17 = vld [vmem:[#allocation5 + $0x118] sm:$0xff] }
  0xae   :  { %818 = vmatpush1.msra.mxu0 %v687_v53  ;;  %894 = vmatprep.subr.mxu1 %v752_v19  ;;  %v734_v53 = vld [vmem:[#allocation5 + $0x218] sm:$0xff]  ;;  %v701_v19 = vld [vmem:[#allocation5 + $0x110] sm:$0xff] }
  0xaf   :  { %819 = vmatprep.subr.mxu0 %v686_v54  ;;  %895 = vmatpush1.msra.mxu1 %v751_v21  ;;  %v715_v54 = vld [vmem:[#allocation5 + $0x180] sm:$0xff] }
  0xb0   :  { %820 = vmatpush1.msra.mxu0 %v685_v55  ;;  %896 = vmatprep.subr.mxu1 %v750_v23  ;;  %v733_v55 = vld [vmem:[#allocation5 + $0x210] sm:$0xff]  ;;  %v699_v21 = vld [vmem:[#allocation5 + $0x100] sm:$0xff] }
  0xb1   :  { %821 = vmatprep.subr.mxu0 %v684_v56  ;;  %897 = vmatpush1.msra.mxu1 %v749_v25  ;;  %v714_v56 = vld [vmem:[#allocation5 + $0x178] sm:$0xff]  ;;  %v783_v23 = vld [vmem:[#allocation5 + $0x3a0] sm:$0xff]  ;;  %v781_v25 = vld [vmem:[#allocation5 + $0x390] sm:$0xff] }
  0xb2   :  { %822 = vmatpush1.msra.mxu0 %v683_v57  ;;  %898 = vmatprep.subr.mxu1 %v748_v27  ;;  %v732_v57 = vld [vmem:[#allocation5 + $0x208] sm:$0xff]  ;;  %v779_v27 = vld [vmem:[#allocation5 + $0x380] sm:$0xff] }
  0xb3   :  { %823 = vmatprep.subr.mxu0 %v682_v58  ;;  %899 = vmatpush1.msra.mxu1 %v747_v29  ;;  %v713_v58 = vld [vmem:[#allocation5 + $0x170] sm:$0xff] }
  0xb4   :  { %824 = vmatpush1.msra.mxu0 %v681_v59  ;;  %900 = vmatprep.subr.mxu1 %v746_v31  ;;  %v712_v59 = vld [vmem:[#allocation5 + $0x168] sm:$0xff]  ;;  %v777_v29 = vld [vmem:[#allocation5 + $0x370] sm:$0xff]  ;;  %v775_v31 = vld [vmem:[#allocation5 + $0x360] sm:$0xff] }
  0xb5   :  { %825 = vmatprep.subr.mxu0 %v680_v60  ;;  %901 = vmatpush1.msra.mxu1 %v745_v35  ;;  %v711_v60 = vld [vmem:[#allocation5 + $0x160] sm:$0xff]  ;;  %v773_v35 = vld [vmem:[#allocation5 + $0x350] sm:$0xff] }
  0xb6   :  { %826 = vmatpush1.msra.mxu0 %v679_v61  ;;  %902 = vmatprep.subr.mxu1 %v744_v37  ;;  %v731_v61 = vld [vmem:[#allocation5 + $0x200] sm:$0xff] }
  0xb7   :  { %827 = vmatprep.subr.mxu0 %v678_v62  ;;  %903 = vmatpush1.msra.mxu1 %v743_v39  ;;  %v794_v62 = vld [vmem:[#allocation5 + $0x3f8] sm:$0xff]  ;;  %v771_v37 = vld [vmem:[#allocation5 + $0x340] sm:$0xff]  ;;  %v769_v39 = vld [vmem:[#allocation5 + $0x330] sm:$0xff] }
  0xb8   :  { %828 = vmatpush1.msra.mxu0 %v677_v2  ;;  %904 = vmatprep.subr.mxu1 %v742_v41  ;;  %v708_v2 = vld [vmem:[#allocation5 + $0x148] sm:$0xff]  ;;  %v767_v41 = vld [vmem:[#allocation5 + $0x320] sm:$0xff] }
  0xb9   :  { %829 = vmatprep.subr.mxu0 %v676_v5  ;;  %905 = vmatpush1.msra.mxu1 %v741_v43  ;;  %v707_v5 = vld [vmem:[#allocation5 + $0x140] sm:$0xff]  ;;  %v765_v43 = vld [vmem:[#allocation5 + $0x310] sm:$0xff] }
  0xba   :  { %830 = vmatpush1.msra.mxu0 %v675_v8  ;;  %906 = vmatprep.subr.mxu1 %v740_v45  ;;  %v791_v8 = vld [vmem:[#allocation5 + $0x3e0] sm:$0xff] }
  0xbb   :  { %831 = vmatprep.subr.mxu0 %v674_v10  ;;  %907 = vmatpush1.msra.mxu1 %v739_v47  ;;  %v704_v10 = vld [vmem:[#allocation5 + $0x128] sm:$0xff]  ;;  %v763_v45 = vld [vmem:[#allocation5 + $0x300] sm:$0xff] }
  0xbc   :  { %832 = vmatpush1.msra.mxu0 %v673_v12  ;;  %908 = vmatprep.subr.mxu1 %v738_v49  ;;  %v789_v12 = vld [vmem:[#allocation5 + $0x3d0] sm:$0xff]  ;;  %v309_v49 = vld [vmem:[%s1688_s2] sm:$0xf] }
  0xbd   :  { %833 = vmatprep.subr.mxu0 %v672_v14  ;;  %909 = vmatpush1.msra.mxu1 %v737_v32  ;;  %v787_v14 = vld [vmem:[#allocation5 + $0x3c0] sm:$0xff] }
  0xbe   :  { %834 = vmatpush1.msra.mxu0 %v671_v16  ;;  %910 = vmatprep.subr.mxu1 %v736_v3  ;;  %v786_v16 = vld [vmem:[#allocation5 + $0x3b8] sm:$0xff] }
  0xbf   :  { %835 = vmatprep.subr.mxu0 %v670_v18  ;;  %911 = vmatpush1.msra.mxu1 %v735_v51  ;;  %v785_v18 = vld [vmem:[#allocation5 + $0x3b0] sm:$0xff] }
  0xc0   :  { %836 = vmatpush1.msra.mxu0 %v669_v20  ;;  %912 = vmatprep.subr.mxu1 %v734_v53  ;;  %v700_v20 = vld [vmem:[#allocation5 + $0x108] sm:$0xff] }
  0xc1   :  { %837 = vmatprep.subr.mxu0 %v668_v22  ;;  %913 = vmatpush1.msra.mxu1 %v733_v55  ;;  %v784_v22 = vld [vmem:[#allocation5 + $0x3a8] sm:$0xff] }
  0xc2   :  { %838 = vmatpush1.msra.mxu0 %v667_v24  ;;  %914 = vmatprep.subr.mxu1 %v732_v57  ;;  %v782_v24 = vld [vmem:[#allocation5 + $0x398] sm:$0xff] }
  0xc3   :  { %839 = vmatprep.subr.mxu0 %v730_v26  ;;  %915 = vmatpush1.msra.mxu1 %v731_v61  ;;  %v780_v26 = vld [vmem:[#allocation5 + $0x388] sm:$0xff] }
  0xc4   :  { %840 = vmatpush2.msra.mxu0 %v729_v28  ;;  %916 = vmatprep.subr.mxu1 %v794_v62  ;;  %v778_v28 = vld [vmem:[#allocation5 + $0x378] sm:$0xff] }
  0xc5   :  { %841 = vmatprep.subr.mxu0 %v728_v30  ;;  %917 = vmatpush2.msra.mxu1 %v793_v4  ;;  %v776_v30 = vld [vmem:[#allocation5 + $0x368] sm:$0xff] }
  0xc6   :  { %842 = vmatpush2.msra.mxu0 %v727_v33  ;;  %918 = vmatprep.subr.mxu1 %v792_v6  ;;  %v774_v33 = vld [vmem:[#allocation5 + $0x358] sm:$0xff] }
  0xc7   :  { %843 = vmatprep.subr.mxu0 %v726_v36  ;;  %919 = vmatpush2.msra.mxu1 %v791_v8  ;;  %v772_v36 = vld [vmem:[#allocation5 + $0x348] sm:$0xff] }
  0xc8   :  { %844 = vmatpush2.msra.mxu0 %v725_v38  ;;  %920 = vmatprep.subr.mxu1 %v790_v11  ;;  %v770_v38 = vld [vmem:[#allocation5 + $0x338] sm:$0xff] }
  0xc9   :  { %845 = vmatprep.subr.mxu0 %v724_v40  ;;  %921 = vmatpush2.msra.mxu1 %v789_v12  ;;  %v768_v40 = vld [vmem:[#allocation5 + $0x328] sm:$0xff] }
  0xca   :  { %846 = vmatpush2.msra.mxu0 %v723_v42  ;;  %922 = vmatprep.subr.mxu1 %v788_v13  ;;  %v766_v42 = vld [vmem:[#allocation5 + $0x318] sm:$0xff] }
  0xcb   :  { %847 = vmatprep.subr.mxu0 %v722_v44  ;;  %923 = vmatpush2.msra.mxu1 %v787_v14  ;;  %v764_v44 = vld [vmem:[#allocation5 + $0x308] sm:$0xff] }
  0xcc   :  { %848 = vmatpush2.msra.mxu0 %v721_v46  ;;  %924 = vmatprep.subr.mxu1 %v786_v16  ;;  %v311_v46 = vlaneseq }
  0xcd   :  { %849 = vmatprep.subr.mxu0 %v720_v48  ;;  %925 = vmatpush2.msra.mxu1 %v785_v18 }
  0xce   :  { %850 = vmatpush2.msra.mxu0 %v719_v1  ;;  %926 = vmatprep.subr.mxu1 %v784_v22  ;;  %v1600_v47 = vshrl.u32 %v311_v46, 7  ;;  %v974_v46 = vld [vmem:[#allocation7 + $0x48] sm:$0xff] }
  0xcf   :  { %851 = vmatprep.subr.mxu0 %v718_v50  ;;  %927 = vmatpush2.msra.mxu1 %v783_v23 }
  0xd0   :  { %852 = vmatpush2.msra.mxu0 %v717_v34  ;;  %928 = vmatprep.subr.mxu1 %v782_v24  ;;  %v313_v48 = vsub.s32 0, %v1600_v47  ;;  %v317_v1 = vsub.s32 1, %v1600_v47  ;;  %v325_v6 = vsub.s32 3, %v1600_v47 }
  0xd1   :  { %853 = vmatprep.subr.mxu0 %v716_v52  ;;  %929 = vmatpush2.msra.mxu1 %v781_v25 }
  0xd2   :  { %854 = vmatpush2.msra.mxu0 %v715_v54  ;;  %930 = vmatprep.subr.mxu1 %v780_v26  ;;  %v314_v32 = vrot.slane %v309_v49, %v313_v48  ;;  %v318_v50 = vrot.slane %v309_v49, %v317_v1  ;;  %v326_v8 = vrot.slane %v309_v49, %v325_v6 }
  0xd3   :  { %855 = vmatprep.subr.mxu0 %v714_v56  ;;  %931 = vmatpush2.msra.mxu1 %v779_v27 }
  0xd4   :  { %856 = vmatpush2.msra.mxu0 %v713_v58  ;;  %932 = vmatprep.subr.mxu1 %v778_v28 }
  0xd5   :  { %857 = vmatprep.subr.mxu0 %v712_v59  ;;  %933 = vmatpush2.msra.mxu1 %v777_v29 }
  0xd6   :  { %858 = vmatpush2.msra.mxu0 %v711_v60  ;;  %934 = vmatprep.subr.mxu1 %v776_v30 }
  0xd7   :  { %859 = vmatprep.subr.mxu0 %v710_v63  ;;  %935 = vmatpush2.msra.mxu1 %v775_v31  ;;  %v996_v31 = vld [vmem:[#allocation7 + $0xf8] sm:$0xff] }
  0xd8   :  { %860 = vmatpush2.msra.mxu0 %v709_v0  ;;  %936 = vmatprep.subr.mxu1 %v774_v33  ;;  %v980_v33 = vld [vmem:[#allocation7 + $0x78] sm:$0xff] }
  0xd9   :  { %861 = vmatprep.subr.mxu0 %v708_v2  ;;  %937 = vmatpush2.msra.mxu1 %v773_v35  ;;  %v995_v35 = vld [vmem:[#allocation7 + $0xf0] sm:$0xff] }
  0xda   :  { %862 = vmatpush2.msra.mxu0 %v707_v5  ;;  %938 = vmatprep.subr.mxu1 %v772_v36  ;;  %v321_v5 = vsub.s32 2, %v1600_v47  ;;  %v979_v36 = vld [vmem:[#allocation7 + $0x70] sm:$0xff] }
  0xdb   :  { %863 = vmatprep.subr.mxu0 %v706_v7  ;;  %939 = vmatpush2.msra.mxu1 %v771_v37  ;;  %v994_v37 = vld [vmem:[#allocation7 + $0xe8] sm:$0xff] }
  0xdc   :  { %864 = vmatpush2.msra.mxu0 %v705_v9  ;;  %940 = vmatprep.subr.mxu1 %v770_v38  ;;  %v322_v7 = vrot.slane %v309_v49, %v321_v5  ;;  %v978_v38 = vld [vmem:[#allocation7 + $0x68] sm:$0xff]  ;;  %v989_v49 = vld [vmem:[#allocation7 + $0xc0] sm:$0xff] }
  0xdd   :  { %865 = vmatprep.subr.mxu0 %v704_v10  ;;  %941 = vmatpush2.msra.mxu1 %v769_v39  ;;  %v993_v39 = vld [vmem:[#allocation7 + $0xe0] sm:$0xff] }
  0xde   :  { %866 = vmatpush2.msra.mxu0 %v703_v15  ;;  %942 = vmatprep.subr.mxu1 %v768_v40  ;;  %v977_v40 = vld [vmem:[#allocation7 + $0x60] sm:$0xff] }
  0xdf   :  { %867 = vmatprep.subr.mxu0 %v702_v17  ;;  %943 = vmatpush2.msra.mxu1 %v767_v41  ;;  %v992_v41 = vld [vmem:[#allocation7 + $0xd8] sm:$0xff]  ;;  %v1095_v5 = vld [vmem:[%s1693_s7 + $0x60] sm:$0xff] }
  0xe0   :  { %868 = vmatpush2.msra.mxu0 %v701_v19  ;;  %944 = vmatprep.subr.mxu1 %v766_v42  ;;  %v976_v42 = vld [vmem:[#allocation7 + $0x58] sm:$0xff] }
  0xe1   :  { %869 = vmatprep.subr.mxu0 %v700_v20  ;;  %945 = vmatpush2.msra.mxu1 %v765_v43  ;;  %v991_v43 = vld [vmem:[#allocation7 + $0xd0] sm:$0xff] }
  0xe2   :  { %870 = vmatpush2.msra.mxu0 %v699_v21  ;;  %946 = vmatprep.subr.mxu1 %v764_v44  ;;  %v975_v44 = vld [vmem:[#allocation7 + $0x50] sm:$0xff] }
  0xe3   :  { %947 = vmatpush2.msra.mxu1 %v763_v45  ;;  %1228 = vmatprep.subr.mxu0 %v996_v31  ;;  %v990_v45 = vld [vmem:[#allocation7 + $0xc8] sm:$0xff]  ;;  %v1089_v31 = vld [vmem:[%s1693_s7 + $0x30] sm:$0xff] }
 0x11c   :  { %v494_v3 = vpop.f32.mrf.mxu1 }
 0x11e   :  { %v496_v54 = vpop.f32.mrf.mxu1 }
 0x12d   :  { %v417_v34 = vpop.f32.mrf.mxu0 }
 0x12e   :  { %v418_v51 = vadd.f32 %v417_v34, %v314_v32  ;;  %v987_v34 = vld [vmem:[#allocation7 + $0xb0] sm:$0xff] }
 0x12f   :  { %v419_v52 = vpop.f32.mrf.mxu0 }
 0x130   :  { %v420_v53 = vadd.f32 %v419_v52, %v318_v50  ;;  %v495_v55 = vadd.f32 %v494_v3, %v418_v51  ;;  %v972_v3 = vld [vmem:[#allocation7 + $0x38] sm:$0xff]  ;;  %v971_v51 = vld [vmem:[#allocation7 + $0x30] sm:$0xff]  ;;  %v986_v52 = vld [vmem:[#allocation7 + $0xa8] sm:$0xff] }
 0x132   :  { %v497_v56 = vadd.f32 %v496_v54, %v420_v53  ;;  %v970_v53 = vld [vmem:[#allocation7 + $0x28] sm:$0xff]  ;;  %v985_v54 = vld [vmem:[#allocation7 + $0xa0] sm:$0xff] }
 0x134   :  { %1330 = vtanh.f32 %v497_v56  ;;  %v984_v56 = vld [vmem:[#allocation7 + $0x98] sm:$0xff] }
 0x135   :  { %1332 = vtanh.f32 %v495_v55  ;;  %v969_v55 = vld [vmem:[#allocation7 + $0x20] sm:$0xff] }
 0x141   :  { %v1331_v57 = vpop.eup %1330 }
 0x142   :  { %v1333_v58 = vpop.eup %1332  ;;  %871 = vmatprep.mubr.f32.mxu0 %v1331_v57  ;;  %v968_v57 = vld [vmem:[#allocation7 + $0x18] sm:$0xff] }
 0x143   :  { %872 = vmatmul.mubr.f32.vlgmr.msra.gmra.mxu0 %v1333_v58  ;;  %v983_v58 = vld [vmem:[#allocation7 + $0x90] sm:$0xff] }
 0x144   :  { %1229 = vmatpush3.msra.mxu0 %v980_v33  ;;  %v1088_v33 = vld [vmem:[%s1693_s7 + $0x28] sm:$0xff] }
 0x145   :  { %1230 = vmatprep.subr.mxu0 %v995_v35  ;;  %v1087_v35 = vld [vmem:[%s1693_s7 + $0x20] sm:$0xff] }
 0x146   :  { %1231 = vmatpush3.msra.mxu0 %v979_v36  ;;  %v1086_v36 = vld [vmem:[%s1693_s7 + $0x18] sm:$0xff] }
 0x147   :  { %1232 = vmatprep.subr.mxu0 %v994_v37  ;;  %v1085_v37 = vld [vmem:[%s1693_s7 + $0x10] sm:$0xff] }
 0x148   :  { %1233 = vmatpush3.msra.mxu0 %v978_v38  ;;  %v1084_v38 = vld [vmem:[%s1693_s7 + $0x8] sm:$0xff] }
 0x149   :  { %1234 = vmatprep.subr.mxu0 %v993_v39  ;;  %v1083_v39 = vld [vmem:[%s1693_s7] sm:$0xff] }
 0x14a   :  { %1235 = vmatpush3.msra.mxu0 %v977_v40 }
 0x14b   :  { %1236 = vmatprep.subr.mxu0 %v992_v41  ;;  %v1226_v41 = vld [vmem:[%s1692_s6] ss:$0 sm:$0xff] }
 0x14c   :  { %1237 = vmatpush3.msra.mxu0 %v976_v42 }
 0x14d   :  { %1238 = vmatprep.subr.mxu0 %v991_v43 }
 0x14e   :  { %1239 = vmatpush3.msra.mxu0 %v975_v44 }
 0x14f   :  { %1240 = vmatprep.subr.mxu0 %v990_v45 }
 0x150   :  { %1241 = vmatpush3.msra.mxu0 %v974_v46 }
 0x151   :  { %1242 = vmatprep.subr.mxu0 %v989_v49 }
 0x153   :  { %v423_v59 = vpop.f32.mrf.mxu0 }
 0x154   :  { %v424_v60 = vadd.f32 %v423_v59, %v314_v32  ;;  %v973_v32 = vld [vmem:[#allocation7 + $0x40] sm:$0xff]  ;;  %v967_v59 = vld [vmem:[#allocation7 + $0x10] sm:$0xff] }
 0x155   :  { %v425_v61 = vpop.f32.mrf.mxu0  ;;  %1243 = vmatpush3.msra.mxu0 %v973_v32 }
 0x156   :  { %v426_v62 = vadd.f32 %v425_v61, %v318_v50  ;;  %v500_v63 = vpop.f32.mrf.mxu1  ;;  %v988_v50 = vld [vmem:[#allocation7 + $0xb8] sm:$0xff]  ;;  %v966_v61 = vld [vmem:[#allocation7 + $0x8] sm:$0xff] }
 0x157   :  { %v501_v0 = vadd.f32 %v500_v63, %v424_v60  ;;  %1244 = vmatprep.subr.mxu0 %v988_v50  ;;  %v982_v60 = vld [vmem:[#allocation7 + $0x88] sm:$0xff]  ;;  %v965_v63 = vld [vmem:[#allocation7] sm:$0xff] }
 0x158   :  { %v502_v2 = vpop.f32.mrf.mxu1  ;;  %1245 = vmatpush3.msra.mxu0 %v972_v3 }
 0x159   :  { %v503_v4 = vadd.f32 %v502_v2, %v426_v62  ;;  %1334 = vtanh.f32 %v501_v0  ;;  %1246 = vmatprep.subr.mxu0 %v987_v34  ;;  %v981_v62 = vld [vmem:[#allocation7 + $0x80] sm:$0xff]  ;;  %v1098_v0 = vld [vmem:[%s1693_s7 + $0x78] sm:$0xff]  ;;  %v1097_v2 = vld [vmem:[%s1693_s7 + $0x70] sm:$0xff] }
 0x15a   :  { %1247 = vmatpush3.msra.mxu0 %v971_v51  ;;  %1284 = vmatprep.subr.mxu1 %v1098_v0 }
 0x15b   :  { %1336 = vtanh.f32 %v503_v4  ;;  %1248 = vmatprep.subr.mxu0 %v986_v52  ;;  %v1096_v4 = vld [vmem:[%s1693_s7 + $0x68] sm:$0xff] }
 0x15c   :  { %1249 = vmatpush3.msra.mxu0 %v970_v53 }
 0x15d   :  { %1250 = vmatprep.subr.mxu0 %v985_v54 }
 0x15e   :  { %1251 = vmatpush3.msra.mxu0 %v969_v55 }
 0x15f   :  { %1252 = vmatprep.subr.mxu0 %v984_v56 }
 0x160   :  { %v571_v9 = vpop.f32.mrf.mxu1  ;;  %1253 = vmatpush3.msra.mxu0 %v968_v57 }
 0x161   :  { %v648_v10 = vpop.f32.mrf.mxu0  ;;  %v572_v11 = vadd.f32 %v571_v9, %v322_v7  ;;  %1254 = vmatprep.subr.mxu0 %v983_v58 }
 0x162   :  { %v573_v12 = vpop.f32.mrf.mxu1  ;;  %1255 = vmatpush3.msra.mxu0 %v967_v59 }
 0x163   :  { %v650_v13 = vpop.f32.mrf.mxu0  ;;  %v574_v14 = vadd.f32 %v573_v12, %v326_v8  ;;  %v649_v15 = vadd.f32 %v648_v10, %v572_v11  ;;  %1256 = vmatprep.subr.mxu0 %v982_v60 }
 0x164   :  { %v577_v16 = vpop.f32.mrf.mxu1  ;;  %1257 = vmatpush3.msra.mxu0 %v966_v61 }
 0x165   :  { %v654_v17 = vpop.f32.mrf.mxu0  ;;  %v651_v18 = vadd.f32 %v650_v13, %v574_v14  ;;  %v578_v19 = vadd.f32 %v577_v16, %v322_v7  ;;  %1258 = vmatprep.subr.mxu0 %v981_v62  ;;  %v795_v7 = vld [vmem:[%s1690_s4] sm:$0x3] }
 0x166   :  { %v1335_v20 = vpop.eup %1334  ;;  %v579_v21 = vpop.f32.mrf.mxu1  ;;  %1259 = vmatpush3.msra.mxu0 %v965_v63  ;;  %v804_v10 = vrot.slane %v795_v7, %v317_v1 }
 0x167   :  { %1338 = vtanh.f32 %v651_v18  ;;  %v580_v23 = vadd.f32 %v579_v21, %v326_v8  ;;  %v655_v24 = vadd.f32 %v654_v17, %v578_v19  ;;  %v656_v25 = vpop.f32.mrf.mxu0  ;;  %v800_v8 = vrot.slane %v795_v7, %v313_v48 }
 0x168   :  { %v1337_v22 = vpop.eup %1336  ;;  %1340 = vtanh.f32 %v649_v15 }
 0x169   :  { %877 = vmatprep.mubr.f32.mxu0 %v1337_v22  ;;  %v657_v26 = vadd.f32 %v656_v25, %v580_v23 }
 0x16a   :  { %878 = vmatmul.mubr.f32.gmra.mxu0 %v1335_v20 }
 0x16b   :  { %1342 = vtanh.f32 %v657_v26  ;;  %v1094_v26 = vld [vmem:[%s1693_s7 + $0x58] sm:$0xff] }
 0x16c   :  { %1344 = vtanh.f32 %v655_v24 }
 0x174   :  { %v1339_v27 = vpop.eup %1338 }
 0x175   :  { %v1341_v28 = vpop.eup %1340  ;;  %948 = vmatprep.mubr.f32.mxu1 %v1339_v27  ;;  %v1093_v27 = vld [vmem:[%s1693_s7 + $0x50] sm:$0xff] }
 0x176   :  { %949 = vmatmul.mubr.f32.vlgmr.msra.gmra.mxu1 %v1341_v28  ;;  %v1092_v28 = vld [vmem:[%s1693_s7 + $0x48] sm:$0xff] }
 0x177   :  { %1285 = vmatpush3.msra.mxu1 %v1098_v0 }
 0x178   :  { %v1343_v29 = vpop.eup %1342  ;;  %1286 = vmatprep.subr.mxu1 %v1097_v2 }
 0x179   :  { %v1345_v30 = vpop.eup %1344  ;;  %954 = vmatprep.mubr.f32.mxu1 %v1343_v29  ;;  %1287 = vmatpush3.msra.mxu1 %v1097_v2  ;;  %v1091_v29 = vld [vmem:[%s1693_s7 + $0x40] sm:$0xff] }
 0x17a   :  { %955 = vmatmul.mubr.f32.gmra.mxu1 %v1345_v30  ;;  %1288 = vmatprep.subr.mxu1 %v1096_v4  ;;  %v1090_v30 = vld [vmem:[%s1693_s7 + $0x38] sm:$0xff]  ;;  %s1475_s7 = smov [#allocation9]  }
 0x17b   :  { %1289 = vmatpush3.msra.mxu1 %v1096_v4  ;;  %s1201_s17 = sshll.u32 %s1475_s7, 4  ;;  %s1202_s17 = int_to_ptr.vmem [resolvable:$true] %s1201_s17 }
 0x17c   :  { %1290 = vmatprep.subr.mxu1 %v1095_v5  ;;  %s1418_s18 = scalar_lea.vmem %s1202_s17, 256  ;;  %p1423_p2 = scmp.lt.s32.totalorder %s1202_s17, %s1202_s17 }
 0x17d   :  { %1291 = vmatpush3.msra.mxu1 %v1095_v5  ;;  %p1419_p1 = scmp.ne.s32.totalorder %s1202_s17, %s1418_s18  ;;  %p1424_p3 = scmp.lt.s32.totalorder %s1418_s18, %s1418_s18 }
 0x17e   :  { %1292 = vmatprep.subr.mxu1 %v1094_v26 }
 0x17f   :  { %1293 = vmatpush3.msra.mxu1 %v1094_v26  ;;  %p1425_p4 = por %p1424_p3, %p1423_p2 }
 0x180   :  { %1294 = vmatprep.subr.mxu1 %v1093_v27 }
 0x181   :  { %1295 = vmatpush3.msra.mxu1 %v1093_v27  ;;  %p1426_p5 = pnand %p1425_p4, %p1419_p1 }
 0x182   :  { %1296 = vmatprep.subr.mxu1 %v1092_v28 }
 0x183   :  { %1297 = vmatpush3.msra.mxu1 %v1092_v28 }
 0x184   :  { %1298 = vmatprep.subr.mxu1 %v1091_v29 }
 0x185   :  { %1299 = vmatpush3.msra.mxu1 %v1091_v29 }
 0x186   :  { %1300 = vmatprep.subr.mxu1 %v1090_v30 }
 0x187   :  { %1301 = vmatpush3.msra.mxu1 %v1090_v30 }
 0x188   :  { %1302 = vmatprep.subr.mxu1 %v1089_v31 }
 0x189   :  { %1303 = vmatpush3.msra.mxu1 %v1089_v31 }
 0x18a   :  { %1304 = vmatprep.subr.mxu1 %v1088_v33 }
 0x18b   :  { %1305 = vmatpush3.msra.mxu1 %v1088_v33 }
 0x18c   :  { %1306 = vmatprep.subr.mxu1 %v1087_v35 }
 0x18d   :  { %1307 = vmatpush3.msra.mxu1 %v1087_v35 }
 0x18e   :  { %1308 = vmatprep.subr.mxu1 %v1086_v36 }
 0x18f   :  { %1309 = vmatpush3.msra.mxu1 %v1086_v36 }
 0x190   :  { %1310 = vmatprep.subr.mxu1 %v1085_v37 }
 0x191   :  { %1311 = vmatpush3.msra.mxu1 %v1085_v37 }
 0x192   :  { %1312 = vmatprep.subr.mxu1 %v1084_v38 }
 0x193   :  { %1313 = vmatpush3.msra.mxu1 %v1084_v38 }
 0x194   :  { %1314 = vmatprep.subr.mxu1 %v1083_v39 }
 0x195   :  { %1315 = vmatpush3.msra.mxu1 %v1083_v39 }
 0x203   :  { %v873_v6 = vpop.f32.mrf.mxu0 }
 0x204   :  { %v874_v12 = vadd.f32 %v873_v6, %v800_v8 }
 0x205   :  { %v875_v9 = vpop.f32.mrf.mxu0 }
 0x206   :  { %v876_v14 = vadd.f32 %v875_v9, %v804_v10 }
 0x22a   :  { %v879_v11 = vpop.f32.mrf.mxu0 }
 0x22b   :  { %v880_v19 = vadd.f32 %v879_v11, %v800_v8 }
 0x22c   :  { %v881_v15 = vpop.f32.mrf.mxu0 }
 0x22d   :  { %v882_v21 = vadd.f32 %v881_v15, %v804_v10 }
 0x236   :  { %v950_v13 = vpop.f32.mrf.mxu1 }
 0x237   :  { %v951_v16 = vadd.f32 %v950_v13, %v874_v12 }
 0x238   :  { %v952_v17 = vpop.f32.mrf.mxu1 }
 0x239   :  { %v953_v18 = vadd.f32 %v952_v17, %v876_v14 }
 0x23a   :  { %v956_v20 = vpop.f32.mrf.mxu1 }
 0x23b   :  { %1346 = vtanh.f32 %v953_v18  ;;  %v957_v22 = vadd.f32 %v956_v20, %v880_v19 }
 0x23c   :  { %1348 = vtanh.f32 %v951_v16  ;;  %v958_v23 = vpop.f32.mrf.mxu1 }
 0x23d   :  { %v959_v48 = vadd.f32 %v958_v23, %v882_v21 }
 0x23f   :  { %1350 = vtanh.f32 %v959_v48 }
 0x240   :  { %1352 = vtanh.f32 %v957_v22 }
 0x248   :  { %v1347_v47 = vpop.eup %1346 }
 0x249   :  { %v1349_v1 = vpop.eup %1348  ;;  %1068 = vmatprep.mubr.f32.mxu0 %v1347_v47 }
 0x24a   :  { %1069 = vmatmul.mubr.f32.vlgmr.msra.gmra.mxu0 %v1349_v1 }
 0x24c   :  { %v1351_v24 = vpop.eup %1350 }
 0x24d   :  { %v1353_v25 = vpop.eup %1352  ;;  %1073 = vmatprep.mubr.f32.mxu0 %v1351_v24 }
 0x24e   :  { %1074 = vmatmul.mubr.f32.gmra.mxu0 %v1353_v25 }
 0x30a   :  { %v1260_v40 = vpop.f32.mrf.mxu0 }
 0x30c   :  { %v1261_v42 = vpop.f32.mrf.mxu0 }
 0x30d   :  { %v1262_v43 = vadd.f32 %v1261_v42, %v1260_v40 }
 0x30e   :  { %v1263_v44 = vpop.f32.mrf.mxu0 }
 0x30f   :  { %v1071_v45 = vadd.f32 %v1262_v43, %v1226_v41 }
 0x310   :  { %v1264_v46 = vpop.f32.mrf.mxu0 }
 0x311   :  { %1354 = vtanh.f32 %v1071_v45  ;;  %v1265_v49 = vadd.f32 %v1264_v46, %v1263_v44 }
 0x313   :  { %v1076_v32 = vadd.f32 %v1265_v49, %v1226_v41 }
 0x315   :  { %1356 = vtanh.f32 %v1076_v32 }
 0x31e   :  { %v1355_v50 = vpop.eup %1354 }
 0x31f   :  { %1081 = vst [vmem:[#allocation9] sm:$0xff] %v1355_v50  ;;  %1316 = vmatprep.mubr.f32.mxu1 %v1355_v50 }
 0x322   :  { %v1357_v3 = vpop.eup %1356 }
 0x323   :  { %1082 = vst [vmem:[#allocation9 + $0x8] sm:$0xff] %v1357_v3  ;;  %1317 = vmatmul.mubr.f32.vlgmr.msra.gmra.mxu1 %v1357_v3 }
 0x324   :  { %1429 = shalt.err (!%p1426_p5)
}
 0x325   :  { %1207 = dma.vmem_to_hbm [thread:$0]  %s1202_s17, 256, %s1696_s10, [#allocation10], %s1473_s29, %s1473_s29, %s1474_s30   ;;  %vm1181_vm2 = vcmask 244736  }
 0x326   :  { %v1227_v34 = vld [vmem:[%s1694_s8] ss:$0 sm:$0xff]  ;;  %s1476_s22 = smov [#allocation8]  }
 0x327   :  { %s1189_s23 = sshll.u32 %s1476_s22, 4  ;;  %s1190_s23 = int_to_ptr.vmem [resolvable:$true] %s1189_s23 }
 0x328   :  { %s1438_s24 = scalar_lea.vmem %s1190_s23, 256  ;;  %p1443_p7 = scmp.lt.s32.totalorder %s1190_s23, %s1190_s23 }
 0x329   :  { %p1439_p6 = scmp.ne.s32.totalorder %s1190_s23, %s1438_s24  ;;  %p1444_p8 = scmp.lt.s32.totalorder %s1438_s24, %s1438_s24 }
 0x32b   :  { %p1445_p9 = por %p1444_p8, %p1443_p7 }
 0x32d   :  { %p1446_p10 = pnand %p1445_p9, %p1439_p6 }
 0x3e3   :  { %v1318_v51 = vpop.f32.mrf.mxu1 }
 0x3e4   :  { %v1178_v52 = vadd.f32 %v1318_v51, %v1227_v34 }
 0x3e5   :  { %v1172_v53 = vpop.f32.mrf.mxu1 }
 0x3e6   :  { %v1173_v54 = vadd.f32 %v1227_v34, %v1172_v53  ;;  %1183 = vst.msk [vmem:[#allocation8 + $0x8] sm:$0xff] %vm1181_vm2, %v1178_v52 }
 0x3e8   :  { %1182 = vst.msk [vmem:[#allocation8] sm:$0xff] %vm1181_vm2, %v1173_v54 }
 0x3e9   :  { %1449 = shalt.err (!%p1446_p10)
}
 0x3ea   :  { %1195 = dma.vmem_to_hbm [thread:$0]  %s1190_s23, 256, %s1695_s9, [#allocation4], %s1473_s29, %s1473_s29, %s1474_s30  }
 0x3eb   :  { %1462 = dma.done.wait [#allocation4], 256  }
 0x3ec   :  { %1463 = vsyncadd [#allocation4], 4294967040 }
 0x3ed   :  { %1464 = dma.done.wait [#allocation10], 256  }
 0x3ee   :  { %1465 = vsyncadd [#allocation10], 4294967040 }
 0x3ef   :  { %1214 = vsyncpa [#allocation3], 1 }
 0x3f0   :  { %1215 = vsyncpa [#allocation6], 1 }
 0x3f1   :  { %1216 = vsyncpa [#allocation4], 1 }
 0x3f2   :  { %1217 = vsyncpa [#allocation10], 1 }

</bundles_post_ra>
